<compile_context>
chip_gen: v6e
topology: v6e:2x2x1
jax: 0.10.0
libtpu: 0.0.40
codegen_flags: <defaults>
</compile_context>

<pallas_src>
import numpy as np
import jax
import jax.numpy as jnp
from jax.experimental import pallas as pl
from jax.experimental.pallas import tpu as pltpu


def _ceil_to(v, m):
    return -(-v // m) * m


def spectral_conv1d_v_kernel(x_ref, vt2_ref, wr_ref, wi_ref, vcr_ref, vci_ref, o_ref):
    """One batch block (tb batch elements) per grid step.

    x_ref  : (Cin, tb, Lp)    real input, channel-major within the block
    vt2_ref: (Lp, 2*Mp)       [Re(Vt) | Im(Vt)]  fused forward VFT matrix
    wr_ref : (Cin, Cout, Mp)  Re(W)
    wi_ref : (Cin, Cout, Mp)  Im(W)
    vcr_ref: (Mp, Lp)         Re(Vc)
    vci_ref: (Mp, Lp)         Im(Vc)
    o_ref  : (Cout, tb, Lp)   real output, channel-major within the block
    """
    cin, tb, lp = x_ref.shape
    cout, mp = wr_ref.shape[1], wr_ref.shape[2]

    # ---- forward VFT: one wide MXU matmul over all Cin*tb rows.  x is real, so lanes [:Mp]
    # are Re(x_ft) and lanes [Mp:] are Im(x_ft).
    xft = jnp.dot(x_ref[...].reshape(cin * tb, lp), vt2_ref[...],
                  preferred_element_type=jnp.float32)            # (Cin*tb, 2*Mp), f32

    # ---- per-mode channel mix, vectorized over the whole (Cout, tb, Mp) block.
    # Loop runs over Cin only; every iteration is full-width VPU work on lane/sublane-aligned
    # slices (tb % 8 == 0, Mp % 128 == 0).  Accumulation stays f32 on every generation
    # (v5e has no bf16 VALUs).
    acc_re = jnp.zeros((cout, tb, mp), jnp.float32)
    acc_im = jnp.zeros((cout, tb, mp), jnp.float32)
    for i in range(cin):
        xr = xft[i * tb:(i + 1) * tb, :mp][None, :, :]           # (1, tb, Mp)
        xi = xft[i * tb:(i + 1) * tb, mp:][None, :, :]           # (1, tb, Mp)
        wr = wr_ref[i][:, None, :]                               # (Cout, 1, Mp)
        wi = wi_ref[i][:, None, :]                               # (Cout, 1, Mp)
        acc_re = acc_re + (xr * wr - xi * wi)
        acc_im = acc_im + (xr * wi + xi * wr)

    # ---- inverse VFT, real part: y = Re(out_ft) @ Re(Vc) - Im(out_ft) @ Im(Vc).
    # Values feed the MXU directly (no scratch write/read round trip); single cast to the
    # matmul compute dtype.
    acc_re2 = acc_re.reshape(cout * tb, mp).astype(vcr_ref.dtype)
    acc_im2 = acc_im.reshape(cout * tb, mp).astype(vcr_ref.dtype)
    y = (jnp.dot(acc_re2, vcr_ref[...], preferred_element_type=jnp.float32)
         - jnp.dot(acc_im2, vci_ref[...], preferred_element_type=jnp.float32))
    o_ref[...] = y.reshape(cout, tb, lp).astype(o_ref.dtype)


def _vmem_limit_bytes():
    # Generation-aware budget: ~75% of per-core VMEM (64 MiB on v7x, 128 MiB on v5e/v6e),
    # leaving headroom for double-buffered x/out blocks and compiler scratch.
    try:
        cap = pltpu.get_tpu_info().vmem_capacity_bytes
        return int(min(cap * 3 // 4, 128 * 1024 * 1024))
    except Exception:
        return 64 * 1024 * 1024


def _choose_batch_block(batch, cin, *, min_rows=128, target_rows=256, want_steps=8):
    """Batch elements per grid step (always a multiple of 8 sublanes).

    Targets ~target_rows MXU rows per step (never below min_rows, which already fills the
    v5e 128-wide MXU), while preferring ~want_steps grid steps when the batch allows it so
    the BlockSpec pipeline overlaps DMA with compute and both v7x TensorCores get work.
    """
    ceil8 = lambda v: _ceil_to(max(v, 1), 8)
    bp8 = ceil8(batch)
    tb_floor = min(bp8, ceil8(-(-min_rows // cin)))
    tb_target = min(bp8, ceil8(-(-target_rows // cin)))
    tb_steps = ceil8(bp8 // want_steps)
    return min(tb_target, max(tb_steps, tb_floor))


def _build_pallas_call(Cin, Cout, tb, Bp, Lp, Mp, single_buffer_invariants):
    inv_kw = {}
    if single_buffer_invariants and hasattr(pl, "Buffered"):
        # Grid-invariant operands are fetched once; no need for double buffers in VMEM.
        inv_kw = dict(pipeline_mode=pl.Buffered(1))
    return pl.pallas_call(
        spectral_conv1d_v_kernel,
        out_shape=jax.ShapeDtypeStruct((Cout, Bp, Lp), jnp.float32),
        grid_spec=pltpu.PrefetchScalarGridSpec(
            num_scalar_prefetch=0,
            grid=(Bp // tb,),
            in_specs=[
                pl.BlockSpec((Cin, tb, Lp), lambda b: (0, b, 0)),                # x batch block
                pl.BlockSpec((Lp, 2 * Mp), lambda b: (0, 0), **inv_kw),          # [Re|Im](Vt)
                pl.BlockSpec((Cin, Cout, Mp), lambda b: (0, 0, 0), **inv_kw),    # Re(W)
                pl.BlockSpec((Cin, Cout, Mp), lambda b: (0, 0, 0), **inv_kw),    # Im(W)
                pl.BlockSpec((Mp, Lp), lambda b: (0, 0), **inv_kw),              # Re(Vc)
                pl.BlockSpec((Mp, Lp), lambda b: (0, 0), **inv_kw),              # Im(Vc)
            ],
            out_specs=pl.BlockSpec((Cout, tb, Lp), lambda b: (0, b, 0)),
        ),
        compiler_params=pltpu.CompilerParams(
            dimension_semantics=("parallel",),
            vmem_limit_bytes=_vmem_limit_bytes(),
        ),
    )


def spectral_conv1d_v(x, vt, vc, weights, *, block_b=None, compute_dtype=jnp.float32):
    """x: (B, Cin, L) real; vt: (L, M) complex; vc: (M, L) complex; weights: (Cin, Cout, M) complex.

    Returns (B, Cout, L) float32 == Re(((x @ Vt) mixed-by-W) @ Vc), matching the PyTorch module.
    compute_dtype=jnp.bfloat16 runs the two VFT matmuls in bf16 (f32 accumulation, f32 mix) for
    several-x MXU throughput and half the Vt/Vc/x VMEM; default f32 preserves complex64 precision.
    """
    B, Cin, L = x.shape
    Cin_w, Cout, M = weights.shape
    assert Cin_w == Cin

    # Pad modes and L to 128-lane multiples (lane-dense MXU operands, unmasked stores).
    # Padded modes / positions are zero-filled everywhere -> contribute nothing.
    Mp = _ceil_to(M, 128)
    Lp = _ceil_to(L, 128)

    tb = block_b if block_b is not None else _choose_batch_block(B, Cin)
    assert tb % 8 == 0, "block_b must be a multiple of 8"
    Bp = _ceil_to(B, tb)

    # Weights: real/imag planes, modes zero-padded; mix stays f32 on all generations.
    w_re = jnp.pad(jnp.real(weights).astype(jnp.float32), ((0, 0), (0, 0), (0, Mp - M)))
    w_im = jnp.pad(jnp.imag(weights).astype(jnp.float32), ((0, 0), (0, 0), (0, Mp - M)))

    # Forward VFT matrix fused as [Re | Im] so a single MXU matmul yields both planes.
    vt_re = jnp.pad(jnp.real(vt).astype(jnp.float32), ((0, Lp - L), (0, Mp - M)))
    vt_im = jnp.pad(jnp.imag(vt).astype(jnp.float32), ((0, Lp - L), (0, Mp - M)))
    vt2 = jnp.concatenate([vt_re, vt_im], axis=1).astype(compute_dtype)      # (Lp, 2*Mp)

    vcr = jnp.pad(jnp.real(vc).astype(jnp.float32), ((0, Mp - M), (0, Lp - L))).astype(compute_dtype)
    vci = jnp.pad(jnp.imag(vc).astype(jnp.float32), ((0, Mp - M), (0, Lp - L))).astype(compute_dtype)

    # Channel-major layout (Cin, Bp, Lp): inside each batch block the rows of one input channel
    # are contiguous, so the in-kernel mix slices aligned (tb, Mp) tiles with no strided access.
    x3 = jnp.transpose(x, (1, 0, 2)).astype(compute_dtype)
    x3 = jnp.pad(x3, ((0, 0), (0, Bp - B), (0, Lp - L)))

    # TODO(synk): for very long sequences on v7x (64 MiB VMEM), add a second grid axis tiling L
    # so Vt/Vc and the x/out blocks are not fully resident.
    args = (x3, vt2, w_re, w_im, vcr, vci)
    try:
        out3 = _build_pallas_call(Cin, Cout, tb, Bp, Lp, Mp, True)(*args)
    except Exception:
        # Fallback for JAX versions without single-buffer pipeline_mode support.
        out3 = _build_pallas_call(Cin, Cout, tb, Bp, Lp, Mp, False)(*args)

    return jnp.transpose(out3[:, :B, :L], (1, 0, 2))             # (B, Cout, L)


def make_vft_matrices(length, modes):
    """Vt: (L, modes), Vc: (modes, L), matching vft1d.make_matrix's intended semantics."""
    positions = 2.0 * np.pi * np.arange(length, dtype=np.float64) / length
    rows = np.arange(modes, dtype=np.float64)[:, None]                    # (modes, 1)
    V = np.exp(-1j * rows * positions[None, :]) / np.sqrt(length)         # (modes, L)
    Vt = jnp.asarray(V.T, dtype=jnp.complex64)                            # (L, modes)
    Vc = jnp.asarray(np.conj(V), dtype=jnp.complex64)                     # (modes, L)
    return Vt, Vc


if __name__ == "__main__":
    B, Cin, Cout, M, L = 2, 4, 4, 8, 16

    key = jax.random.PRNGKey(0)
    k_x, k_wr, k_wi = jax.random.split(key, 3)

    # Input: (B, Cin, L) real, like the PyTorch forward's x before x.cfloat()
    x = jax.random.normal(k_x, (B, Cin, L), dtype=jnp.float32)

    # weights1 = scale * torch.rand(in, out, modes, dtype=cfloat): re/im each uniform [0,1)*scale
    scale = 1.0 / (Cin * Cout)
    w_re = scale * jax.random.uniform(k_wr, (Cin, Cout, M), dtype=jnp.float32)
    w_im = scale * jax.random.uniform(k_wi, (Cin, Cout, M), dtype=jnp.float32)
    weights = (w_re + 1j * w_im).astype(jnp.complex64)

    Vt, Vc = make_vft_matrices(L, M)

    y = spectral_conv1d_v(x, Vt, Vc, weights)
    y = jax.block_until_ready(y)

    # Pure-JAX complex reference (mirrors the PyTorch forward exactly).
    x_ft = jnp.einsum('bil,lm->bim', x.astype(jnp.complex64), Vt)
    out_ft = jnp.einsum('bim,iom->bom', x_ft, weights)
    y_ref = jnp.real(jnp.einsum('bom,ml->bol', out_ft, Vc))

    assert y.shape == (B, Cout, L)
    np.testing.assert_allclose(np.asarray(y), np.asarray(y_ref), rtol=1e-4, atol=1e-5)

    print("KERNEL_OK")
</pallas_src>

<mosaic_0001>
module attributes {stable_mosaic.version = 11 : i64} {
  func.func @spectral_conv1d_v_kernel(%arg0: i32, %arg1: memref<4x8x128xf32, #tpu.memory_space<vmem>>, %arg2: memref<128x256xf32, #tpu.memory_space<vmem>>, %arg3: memref<4x4x128xf32, #tpu.memory_space<vmem>>, %arg4: memref<4x4x128xf32, #tpu.memory_space<vmem>>, %arg5: memref<128x128xf32, #tpu.memory_space<vmem>>, %arg6: memref<128x128xf32, #tpu.memory_space<vmem>>, %arg7: memref<4x8x128xf32, #tpu.memory_space<vmem>>) attributes {dimension_semantics = [#tpu.dimension_semantics<parallel>], iteration_bounds = array<i64: 1>, scalar_prefetch = 0 : i64, scratch_operands = 0 : i64, tpu.core_type = #tpu.core_type<tc>, window_params = [{transform_indices = @transform_0, window_bounds = array<i64: 4, 8, 128>}, {pipeline_mode = #tpu.pipeline_mode<synchronous>, transform_indices = @transform_1, window_bounds = array<i64: 128, 256>}, {pipeline_mode = #tpu.pipeline_mode<synchronous>, transform_indices = @transform_2, window_bounds = array<i64: 4, 4, 128>}, {pipeline_mode = #tpu.pipeline_mode<synchronous>, transform_indices = @transform_3, window_bounds = array<i64: 4, 4, 128>}, {pipeline_mode = #tpu.pipeline_mode<synchronous>, transform_indices = @transform_4, window_bounds = array<i64: 128, 128>}, {pipeline_mode = #tpu.pipeline_mode<synchronous>, transform_indices = @transform_5, window_bounds = array<i64: 128, 128>}, {transform_indices = @transform_6, window_bounds = array<i64: 4, 8, 128>}]} {
    %c0 = arith.constant 0 : index
    %c0_0 = arith.constant 0 : index
    %c0_1 = arith.constant 0 : index
    %0 = vector.load %arg1[%c0, %c0_0, %c0_1] : memref<4x8x128xf32, #tpu.memory_space<vmem>>, vector<4x8x128xf32>
    %1 = vector.shape_cast %0 : vector<4x8x128xf32> to vector<32x128xf32>
    %c0_2 = arith.constant 0 : index
    %c0_3 = arith.constant 0 : index
    %2 = vector.load %arg2[%c0_2, %c0_3] : memref<128x256xf32, #tpu.memory_space<vmem>>, vector<128x256xf32>
    %cst = arith.constant dense<0.000000e+00> : vector<32x256xf32>
    %3 = tpu.matmul %1, %2, %cst {dimension_numbers = #tpu.dot_dimension_numbers<[1], [0], [0], [1], [0, 0, 1, 1], [], []>} : vector<32x128xf32>, vector<128x256xf32>, vector<32x256xf32> -> vector<32x256xf32>
    %cst_4 = arith.constant 0.000000e+00 : f32
    %4 = vector.broadcast %cst_4 : f32 to vector<4x8x128xf32>
    %cst_5 = arith.constant 0.000000e+00 : f32
    %5 = vector.broadcast %cst_5 : f32 to vector<4x8x128xf32>
    %6 = vector.extract_strided_slice %3 {offsets = [0, 0], sizes = [8, 128], strides = [1, 1]} : vector<32x256xf32> to vector<8x128xf32>
    %7 = vector.shape_cast %6 : vector<8x128xf32> to vector<1x8x128xf32>
    %8 = vector.extract_strided_slice %3 {offsets = [0, 128], sizes = [8, 128], strides = [1, 1]} : vector<32x256xf32> to vector<8x128xf32>
    %9 = vector.shape_cast %8 : vector<8x128xf32> to vector<1x8x128xf32>
    %c0_6 = arith.constant 0 : index
    %c0_7 = arith.constant 0 : index
    %c0_8 = arith.constant 0 : index
    %10 = vector.load %arg3[%c0_6, %c0_7, %c0_8] : memref<4x4x128xf32, #tpu.memory_space<vmem>>, vector<1x4x128xf32>
    %11 = vector.shape_cast %10 : vector<1x4x128xf32> to vector<4x128xf32>
    %12 = vector.shape_cast %11 : vector<4x128xf32> to vector<4x1x128xf32>
    %c0_9 = arith.constant 0 : index
    %c0_10 = arith.constant 0 : index
    %c0_11 = arith.constant 0 : index
    %13 = vector.load %arg4[%c0_9, %c0_10, %c0_11] : memref<4x4x128xf32, #tpu.memory_space<vmem>>, vector<1x4x128xf32>
    %14 = vector.shape_cast %13 : vector<1x4x128xf32> to vector<4x128xf32>
    %15 = vector.shape_cast %14 : vector<4x128xf32> to vector<4x1x128xf32>
    %16 = vector.broadcast %7 : vector<1x8x128xf32> to vector<4x8x128xf32>
    %17 = vector.broadcast %12 : vector<4x1x128xf32> to vector<4x8x128xf32>
    %18 = arith.mulf %16, %17 : vector<4x8x128xf32>
    %19 = vector.broadcast %9 : vector<1x8x128xf32> to vector<4x8x128xf32>
    %20 = vector.broadcast %15 : vector<4x1x128xf32> to vector<4x8x128xf32>
    %21 = arith.mulf %19, %20 : vector<4x8x128xf32>
    %22 = arith.subf %18, %21 : vector<4x8x128xf32>
    %23 = arith.addf %4, %22 : vector<4x8x128xf32>
    %24 = vector.broadcast %7 : vector<1x8x128xf32> to vector<4x8x128xf32>
    %25 = vector.broadcast %15 : vector<4x1x128xf32> to vector<4x8x128xf32>
    %26 = arith.mulf %24, %25 : vector<4x8x128xf32>
    %27 = vector.broadcast %9 : vector<1x8x128xf32> to vector<4x8x128xf32>
    %28 = vector.broadcast %12 : vector<4x1x128xf32> to vector<4x8x128xf32>
    %29 = arith.mulf %27, %28 : vector<4x8x128xf32>
    %30 = arith.addf %26, %29 : vector<4x8x128xf32>
    %31 = arith.addf %5, %30 : vector<4x8x128xf32>
    %32 = vector.extract_strided_slice %3 {offsets = [8, 0], sizes = [8, 128], strides = [1, 1]} : vector<32x256xf32> to vector<8x128xf32>
    %33 = vector.shape_cast %32 : vector<8x128xf32> to vector<1x8x128xf32>
    %34 = vector.extract_strided_slice %3 {offsets = [8, 128], sizes = [8, 128], strides = [1, 1]} : vector<32x256xf32> to vector<8x128xf32>
    %35 = vector.shape_cast %34 : vector<8x128xf32> to vector<1x8x128xf32>
    %c1 = arith.constant 1 : index
    %c0_12 = arith.constant 0 : index
    %c0_13 = arith.constant 0 : index
    %36 = vector.load %arg3[%c1, %c0_12, %c0_13] : memref<4x4x128xf32, #tpu.memory_space<vmem>>, vector<1x4x128xf32>
    %37 = vector.shape_cast %36 : vector<1x4x128xf32> to vector<4x128xf32>
    %38 = vector.shape_cast %37 : vector<4x128xf32> to vector<4x1x128xf32>
    %c1_14 = arith.constant 1 : index
    %c0_15 = arith.constant 0 : index
    %c0_16 = arith.constant 0 : index
    %39 = vector.load %arg4[%c1_14, %c0_15, %c0_16] : memref<4x4x128xf32, #tpu.memory_space<vmem>>, vector<1x4x128xf32>
    %40 = vector.shape_cast %39 : vector<1x4x128xf32> to vector<4x128xf32>
    %41 = vector.shape_cast %40 : vector<4x128xf32> to vector<4x1x128xf32>
    %42 = vector.broadcast %33 : vector<1x8x128xf32> to vector<4x8x128xf32>
    %43 = vector.broadcast %38 : vector<4x1x128xf32> to vector<4x8x128xf32>
    %44 = arith.mulf %42, %43 : vector<4x8x128xf32>
    %45 = vector.broadcast %35 : vector<1x8x128xf32> to vector<4x8x128xf32>
    %46 = vector.broadcast %41 : vector<4x1x128xf32> to vector<4x8x128xf32>
    %47 = arith.mulf %45, %46 : vector<4x8x128xf32>
    %48 = arith.subf %44, %47 : vector<4x8x128xf32>
    %49 = arith.addf %23, %48 : vector<4x8x128xf32>
    %50 = vector.broadcast %33 : vector<1x8x128xf32> to vector<4x8x128xf32>
    %51 = vector.broadcast %41 : vector<4x1x128xf32> to vector<4x8x128xf32>
    %52 = arith.mulf %50, %51 : vector<4x8x128xf32>
    %53 = vector.broadcast %35 : vector<1x8x128xf32> to vector<4x8x128xf32>
    %54 = vector.broadcast %38 : vector<4x1x128xf32> to vector<4x8x128xf32>
    %55 = arith.mulf %53, %54 : vector<4x8x128xf32>
    %56 = arith.addf %52, %55 : vector<4x8x128xf32>
    %57 = arith.addf %31, %56 : vector<4x8x128xf32>
    %58 = vector.extract_strided_slice %3 {offsets = [16, 0], sizes = [8, 128], strides = [1, 1]} : vector<32x256xf32> to vector<8x128xf32>
    %59 = vector.shape_cast %58 : vector<8x128xf32> to vector<1x8x128xf32>
    %60 = vector.extract_strided_slice %3 {offsets = [16, 128], sizes = [8, 128], strides = [1, 1]} : vector<32x256xf32> to vector<8x128xf32>
    %61 = vector.shape_cast %60 : vector<8x128xf32> to vector<1x8x128xf32>
    %c2 = arith.constant 2 : index
    %c0_17 = arith.constant 0 : index
    %c0_18 = arith.constant 0 : index
    %62 = vector.load %arg3[%c2, %c0_17, %c0_18] : memref<4x4x128xf32, #tpu.memory_space<vmem>>, vector<1x4x128xf32>
    %63 = vector.shape_cast %62 : vector<1x4x128xf32> to vector<4x128xf32>
    %64 = vector.shape_cast %63 : vector<4x128xf32> to vector<4x1x128xf32>
    %c2_19 = arith.constant 2 : index
    %c0_20 = arith.constant 0 : index
    %c0_21 = arith.constant 0 : index
    %65 = vector.load %arg4[%c2_19, %c0_20, %c0_21] : memref<4x4x128xf32, #tpu.memory_space<vmem>>, vector<1x4x128xf32>
    %66 = vector.shape_cast %65 : vector<1x4x128xf32> to vector<4x128xf32>
    %67 = vector.shape_cast %66 : vector<4x128xf32> to vector<4x1x128xf32>
    %68 = vector.broadcast %59 : vector<1x8x128xf32> to vector<4x8x128xf32>
    %69 = vector.broadcast %64 : vector<4x1x128xf32> to vector<4x8x128xf32>
    %70 = arith.mulf %68, %69 : vector<4x8x128xf32>
    %71 = vector.broadcast %61 : vector<1x8x128xf32> to vector<4x8x128xf32>
    %72 = vector.broadcast %67 : vector<4x1x128xf32> to vector<4x8x128xf32>
    %73 = arith.mulf %71, %72 : vector<4x8x128xf32>
    %74 = arith.subf %70, %73 : vector<4x8x128xf32>
    %75 = arith.addf %49, %74 : vector<4x8x128xf32>
    %76 = vector.broadcast %59 : vector<1x8x128xf32> to vector<4x8x128xf32>
    %77 = vector.broadcast %67 : vector<4x1x128xf32> to vector<4x8x128xf32>
    %78 = arith.mulf %76, %77 : vector<4x8x128xf32>
    %79 = vector.broadcast %61 : vector<1x8x128xf32> to vector<4x8x128xf32>
    %80 = vector.broadcast %64 : vector<4x1x128xf32> to vector<4x8x128xf32>
    %81 = arith.mulf %79, %80 : vector<4x8x128xf32>
    %82 = arith.addf %78, %81 : vector<4x8x128xf32>
    %83 = arith.addf %57, %82 : vector<4x8x128xf32>
    %84 = vector.extract_strided_slice %3 {offsets = [24, 0], sizes = [8, 128], strides = [1, 1]} : vector<32x256xf32> to vector<8x128xf32>
    %85 = vector.shape_cast %84 : vector<8x128xf32> to vector<1x8x128xf32>
    %86 = vector.extract_strided_slice %3 {offsets = [24, 128], sizes = [8, 128], strides = [1, 1]} : vector<32x256xf32> to vector<8x128xf32>
    %87 = vector.shape_cast %86 : vector<8x128xf32> to vector<1x8x128xf32>
    %c3 = arith.constant 3 : index
    %c0_22 = arith.constant 0 : index
    %c0_23 = arith.constant 0 : index
    %88 = vector.load %arg3[%c3, %c0_22, %c0_23] : memref<4x4x128xf32, #tpu.memory_space<vmem>>, vector<1x4x128xf32>
    %89 = vector.shape_cast %88 : vector<1x4x128xf32> to vector<4x128xf32>
    %90 = vector.shape_cast %89 : vector<4x128xf32> to vector<4x1x128xf32>
    %c3_24 = arith.constant 3 : index
    %c0_25 = arith.constant 0 : index
    %c0_26 = arith.constant 0 : index
    %91 = vector.load %arg4[%c3_24, %c0_25, %c0_26] : memref<4x4x128xf32, #tpu.memory_space<vmem>>, vector<1x4x128xf32>
    %92 = vector.shape_cast %91 : vector<1x4x128xf32> to vector<4x128xf32>
    %93 = vector.shape_cast %92 : vector<4x128xf32> to vector<4x1x128xf32>
    %94 = vector.broadcast %85 : vector<1x8x128xf32> to vector<4x8x128xf32>
    %95 = vector.broadcast %90 : vector<4x1x128xf32> to vector<4x8x128xf32>
    %96 = arith.mulf %94, %95 : vector<4x8x128xf32>
    %97 = vector.broadcast %87 : vector<1x8x128xf32> to vector<4x8x128xf32>
    %98 = vector.broadcast %93 : vector<4x1x128xf32> to vector<4x8x128xf32>
    %99 = arith.mulf %97, %98 : vector<4x8x128xf32>
    %100 = arith.subf %96, %99 : vector<4x8x128xf32>
    %101 = arith.addf %75, %100 : vector<4x8x128xf32>
    %102 = vector.broadcast %85 : vector<1x8x128xf32> to vector<4x8x128xf32>
    %103 = vector.broadcast %93 : vector<4x1x128xf32> to vector<4x8x128xf32>
    %104 = arith.mulf %102, %103 : vector<4x8x128xf32>
    %105 = vector.broadcast %87 : vector<1x8x128xf32> to vector<4x8x128xf32>
    %106 = vector.broadcast %90 : vector<4x1x128xf32> to vector<4x8x128xf32>
    %107 = arith.mulf %105, %106 : vector<4x8x128xf32>
    %108 = arith.addf %104, %107 : vector<4x8x128xf32>
    %109 = arith.addf %83, %108 : vector<4x8x128xf32>
    %110 = vector.shape_cast %101 : vector<4x8x128xf32> to vector<32x128xf32>
    %111 = vector.shape_cast %109 : vector<4x8x128xf32> to vector<32x128xf32>
    %c0_27 = arith.constant 0 : index
    %c0_28 = arith.constant 0 : index
    %112 = vector.load %arg5[%c0_27, %c0_28] : memref<128x128xf32, #tpu.memory_space<vmem>>, vector<128x128xf32>
    %cst_29 = arith.constant dense<0.000000e+00> : vector<32x128xf32>
    %113 = tpu.matmul %110, %112, %cst_29 {dimension_numbers = #tpu.dot_dimension_numbers<[1], [0], [0], [1], [0, 0, 1, 1], [], []>} : vector<32x128xf32>, vector<128x128xf32>, vector<32x128xf32> -> vector<32x128xf32>
    %c0_30 = arith.constant 0 : index
    %c0_31 = arith.constant 0 : index
    %114 = vector.load %arg6[%c0_30, %c0_31] : memref<128x128xf32, #tpu.memory_space<vmem>>, vector<128x128xf32>
    %cst_32 = arith.constant dense<0.000000e+00> : vector<32x128xf32>
    %115 = tpu.matmul %111, %114, %cst_32 {dimension_numbers = #tpu.dot_dimension_numbers<[1], [0], [0], [1], [0, 0, 1, 1], [], []>} : vector<32x128xf32>, vector<128x128xf32>, vector<32x128xf32> -> vector<32x128xf32>
    %116 = arith.subf %113, %115 : vector<32x128xf32>
    %117 = vector.shape_cast %116 : vector<32x128xf32> to vector<4x8x128xf32>
    %c0_33 = arith.constant 0 : index
    %c0_34 = arith.constant 0 : index
    %c0_35 = arith.constant 0 : index
    %118 = vector.load %arg7[%c0_33, %c0_34, %c0_35] : memref<4x8x128xf32, #tpu.memory_space<vmem>>, vector<4x8x128xf32>
    tpu.vector_store %arg7[%c0_33, %c0_34, %c0_35], %117 {strides = array<i32>} : memref<4x8x128xf32, #tpu.memory_space<vmem>>, vector<4x8x128xf32>,
    return
  }
  func.func @transform_0(%arg0: i32) -> (i32, i32, i32) {
    %c0_i32 = arith.constant 0 : i32
    %c0_i32_0 = arith.constant 0 : i32
    %c0_i32_1 = arith.constant 0 : i32
    return %c0_i32, %arg0, %c0_i32_0 : i32, i32, i32
  }
  func.func @transform_1(%arg0: i32) -> (i32, i32) {
    %c0_i32 = arith.constant 0 : i32
    %c0_i32_0 = arith.constant 0 : i32
    %c0_i32_1 = arith.constant 0 : i32
    return %c0_i32, %c0_i32_0 : i32, i32
  }
  func.func @transform_2(%arg0: i32) -> (i32, i32, i32) {
    %c0_i32 = arith.constant 0 : i32
    %c0_i32_0 = arith.constant 0 : i32
    %c0_i32_1 = arith.constant 0 : i32
    %c0_i32_2 = arith.constant 0 : i32
    return %c0_i32, %c0_i32_0, %c0_i32_1 : i32, i32, i32
  }
  func.func @transform_3(%arg0: i32) -> (i32, i32, i32) {
    %c0_i32 = arith.constant 0 : i32
    %c0_i32_0 = arith.constant 0 : i32
    %c0_i32_1 = arith.constant 0 : i32
    %c0_i32_2 = arith.constant 0 : i32
    return %c0_i32, %c0_i32_0, %c0_i32_1 : i32, i32, i32
  }
  func.func @transform_4(%arg0: i32) -> (i32, i32) {
    %c0_i32 = arith.constant 0 : i32
    %c0_i32_0 = arith.constant 0 : i32
    %c0_i32_1 = arith.constant 0 : i32
    return %c0_i32, %c0_i32_0 : i32, i32
  }
  func.func @transform_5(%arg0: i32) -> (i32, i32) {
    %c0_i32 = arith.constant 0 : i32
    %c0_i32_0 = arith.constant 0 : i32
    %c0_i32_1 = arith.constant 0 : i32
    return %c0_i32, %c0_i32_0 : i32, i32
  }
  func.func @transform_6(%arg0: i32) -> (i32, i32, i32) {
    %c0_i32 = arith.constant 0 : i32
    %c0_i32_0 = arith.constant 0 : i32
    %c0_i32_1 = arith.constant 0 : i32
    return %c0_i32, %arg0, %c0_i32_0 : i32, i32, i32
  }
}

module attributes {stable_mosaic.version = 11 : i64} {
  func.func @spectral_conv1d_v_kernel(%arg0: i32, %arg1: memref<4x8x128xf32, #tpu.memory_space<vmem>>, %arg2: memref<128x256xf32, #tpu.memory_space<vmem>>, %arg3: memref<4x4x128xf32, #tpu.memory_space<vmem>>, %arg4: memref<4x4x128xf32, #tpu.memory_space<vmem>>, %arg5: memref<128x128xf32, #tpu.memory_space<vmem>>, %arg6: memref<128x128xf32, #tpu.memory_space<vmem>>, %arg7: memref<4x8x128xf32, #tpu.memory_space<vmem>>) attributes {dimension_semantics = [#tpu.dimension_semantics<parallel>], iteration_bounds = array<i64: 1>, scalar_prefetch = 0 : i64, scratch_operands = 0 : i64, tpu.core_type = #tpu.core_type<tc>, window_params = [{transform_indices = @transform_0, window_bounds = array<i64: 4, 8, 128>}, {pipeline_mode = #tpu.pipeline_mode<synchronous>, transform_indices = @transform_1, window_bounds = array<i64: 128, 256>}, {pipeline_mode = #tpu.pipeline_mode<synchronous>, transform_indices = @transform_2, window_bounds = array<i64: 4, 4, 128>}, {pipeline_mode = #tpu.pipeline_mode<synchronous>, transform_indices = @transform_3, window_bounds = array<i64: 4, 4, 128>}, {pipeline_mode = #tpu.pipeline_mode<synchronous>, transform_indices = @transform_4, window_bounds = array<i64: 128, 128>}, {pipeline_mode = #tpu.pipeline_mode<synchronous>, transform_indices = @transform_5, window_bounds = array<i64: 128, 128>}, {transform_indices = @transform_6, window_bounds = array<i64: 4, 8, 128>}]} {
    %c0 = arith.constant 0 : index
    %c0_0 = arith.constant 0 : index
    %c0_1 = arith.constant 0 : index
    %0 = vector.load %arg1[%c0, %c0_0, %c0_1] : memref<4x8x128xf32, #tpu.memory_space<vmem>>, vector<4x8x128xf32>
    %1 = vector.shape_cast %0 : vector<4x8x128xf32> to vector<32x128xf32>
    %c0_2 = arith.constant 0 : index
    %c0_3 = arith.constant 0 : index
    %2 = vector.load %arg2[%c0_2, %c0_3] : memref<128x256xf32, #tpu.memory_space<vmem>>, vector<128x256xf32>
    %cst = arith.constant dense<0.000000e+00> : vector<32x256xf32>
    %3 = tpu.matmul %1, %2, %cst {dimension_numbers = #tpu.dot_dimension_numbers<[1], [0], [0], [1], [0, 0, 1, 1], [], []>} : vector<32x128xf32>, vector<128x256xf32>, vector<32x256xf32> -> vector<32x256xf32>
    %cst_4 = arith.constant 0.000000e+00 : f32
    %4 = vector.broadcast %cst_4 : f32 to vector<4x8x128xf32>
    %cst_5 = arith.constant 0.000000e+00 : f32
    %5 = vector.broadcast %cst_5 : f32 to vector<4x8x128xf32>
    %6 = vector.extract_strided_slice %3 {offsets = [0, 0], sizes = [8, 128], strides = [1, 1]} : vector<32x256xf32> to vector<8x128xf32>
    %7 = vector.shape_cast %6 : vector<8x128xf32> to vector<1x8x128xf32>
    %8 = vector.extract_strided_slice %3 {offsets = [0, 128], sizes = [8, 128], strides = [1, 1]} : vector<32x256xf32> to vector<8x128xf32>
    %9 = vector.shape_cast %8 : vector<8x128xf32> to vector<1x8x128xf32>
    %c0_6 = arith.constant 0 : index
    %c0_7 = arith.constant 0 : index
    %c0_8 = arith.constant 0 : index
    %10 = vector.load %arg3[%c0_6, %c0_7, %c0_8] : memref<4x4x128xf32, #tpu.memory_space<vmem>>, vector<1x4x128xf32>
    %11 = vector.shape_cast %10 : vector<1x4x128xf32> to vector<4x128xf32>
    %12 = vector.shape_cast %11 : vector<4x128xf32> to vector<4x1x128xf32>
    %c0_9 = arith.constant 0 : index
    %c0_10 = arith.constant 0 : index
    %c0_11 = arith.constant 0 : index
    %13 = vector.load %arg4[%c0_9, %c0_10, %c0_11] : memref<4x4x128xf32, #tpu.memory_space<vmem>>, vector<1x4x128xf32>
    %14 = vector.shape_cast %13 : vector<1x4x128xf32> to vector<4x128xf32>
    %15 = vector.shape_cast %14 : vector<4x128xf32> to vector<4x1x128xf32>
    %16 = vector.broadcast %7 : vector<1x8x128xf32> to vector<4x8x128xf32>
    %17 = vector.broadcast %12 : vector<4x1x128xf32> to vector<4x8x128xf32>
    %18 = arith.mulf %16, %17 : vector<4x8x128xf32>
    %19 = vector.broadcast %9 : vector<1x8x128xf32> to vector<4x8x128xf32>
    %20 = vector.broadcast %15 : vector<4x1x128xf32> to vector<4x8x128xf32>
    %21 = arith.mulf %19, %20 : vector<4x8x128xf32>
    %22 = arith.subf %18, %21 : vector<4x8x128xf32>
    %23 = arith.addf %4, %22 : vector<4x8x128xf32>
    %24 = vector.broadcast %7 : vector<1x8x128xf32> to vector<4x8x128xf32>
    %25 = vector.broadcast %15 : vector<4x1x128xf32> to vector<4x8x128xf32>
    %26 = arith.mulf %24, %25 : vector<4x8x128xf32>
    %27 = vector.broadcast %9 : vector<1x8x128xf32> to vector<4x8x128xf32>
    %28 = vector.broadcast %12 : vector<4x1x128xf32> to vector<4x8x128xf32>
    %29 = arith.mulf %27, %28 : vector<4x8x128xf32>
    %30 = arith.addf %26, %29 : vector<4x8x128xf32>
    %31 = arith.addf %5, %30 : vector<4x8x128xf32>
    %32 = vector.extract_strided_slice %3 {offsets = [8, 0], sizes = [8, 128], strides = [1, 1]} : vector<32x256xf32> to vector<8x128xf32>
    %33 = vector.shape_cast %32 : vector<8x128xf32> to vector<1x8x128xf32>
    %34 = vector.extract_strided_slice %3 {offsets = [8, 128], sizes = [8, 128], strides = [1, 1]} : vector<32x256xf32> to vector<8x128xf32>
    %35 = vector.shape_cast %34 : vector<8x128xf32> to vector<1x8x128xf32>
    %c1 = arith.constant 1 : index
    %c0_12 = arith.constant 0 : index
    %c0_13 = arith.constant 0 : index
    %36 = vector.load %arg3[%c1, %c0_12, %c0_13] : memref<4x4x128xf32, #tpu.memory_space<vmem>>, vector<1x4x128xf32>
    %37 = vector.shape_cast %36 : vector<1x4x128xf32> to vector<4x128xf32>
    %38 = vector.shape_cast %37 : vector<4x128xf32> to vector<4x1x128xf32>
    %c1_14 = arith.constant 1 : index
    %c0_15 = arith.constant 0 : index
    %c0_16 = arith.constant 0 : index
    %39 = vector.load %arg4[%c1_14, %c0_15, %c0_16] : memref<4x4x128xf32, #tpu.memory_space<vmem>>, vector<1x4x128xf32>
    %40 = vector.shape_cast %39 : vector<1x4x128xf32> to vector<4x128xf32>
    %41 = vector.shape_cast %40 : vector<4x128xf32> to vector<4x1x128xf32>
    %42 = vector.broadcast %33 : vector<1x8x128xf32> to vector<4x8x128xf32>
    %43 = vector.broadcast %38 : vector<4x1x128xf32> to vector<4x8x128xf32>
    %44 = arith.mulf %42, %43 : vector<4x8x128xf32>
    %45 = vector.broadcast %35 : vector<1x8x128xf32> to vector<4x8x128xf32>
    %46 = vector.broadcast %41 : vector<4x1x128xf32> to vector<4x8x128xf32>
    %47 = arith.mulf %45, %46 : vector<4x8x128xf32>
    %48 = arith.subf %44, %47 : vector<4x8x128xf32>
    %49 = arith.addf %23, %48 : vector<4x8x128xf32>
    %50 = vector.broadcast %33 : vector<1x8x128xf32> to vector<4x8x128xf32>
    %51 = vector.broadcast %41 : vector<4x1x128xf32> to vector<4x8x128xf32>
    %52 = arith.mulf %50, %51 : vector<4x8x128xf32>
    %53 = vector.broadcast %35 : vector<1x8x128xf32> to vector<4x8x128xf32>
    %54 = vector.broadcast %38 : vector<4x1x128xf32> to vector<4x8x128xf32>
    %55 = arith.mulf %53, %54 : vector<4x8x128xf32>
    %56 = arith.addf %52, %55 : vector<4x8x128xf32>
    %57 = arith.addf %31, %56 : vector<4x8x128xf32>
    %58 = vector.extract_strided_slice %3 {offsets = [16, 0], sizes = [8, 128], strides = [1, 1]} : vector<32x256xf32> to vector<8x128xf32>
    %59 = vector.shape_cast %58 : vector<8x128xf32> to vector<1x8x128xf32>
    %60 = vector.extract_strided_slice %3 {offsets = [16, 128], sizes = [8, 128], strides = [1, 1]} : vector<32x256xf32> to vector<8x128xf32>
    %61 = vector.shape_cast %60 : vector<8x128xf32> to vector<1x8x128xf32>
    %c2 = arith.constant 2 : index
    %c0_17 = arith.constant 0 : index
    %c0_18 = arith.constant 0 : index
    %62 = vector.load %arg3[%c2, %c0_17, %c0_18] : memref<4x4x128xf32, #tpu.memory_space<vmem>>, vector<1x4x128xf32>
    %63 = vector.shape_cast %62 : vector<1x4x128xf32> to vector<4x128xf32>
    %64 = vector.shape_cast %63 : vector<4x128xf32> to vector<4x1x128xf32>
    %c2_19 = arith.constant 2 : index
    %c0_20 = arith.constant 0 : index
    %c0_21 = arith.constant 0 : index
    %65 = vector.load %arg4[%c2_19, %c0_20, %c0_21] : memref<4x4x128xf32, #tpu.memory_space<vmem>>, vector<1x4x128xf32>
    %66 = vector.shape_cast %65 : vector<1x4x128xf32> to vector<4x128xf32>
    %67 = vector.shape_cast %66 : vector<4x128xf32> to vector<4x1x128xf32>
    %68 = vector.broadcast %59 : vector<1x8x128xf32> to vector<4x8x128xf32>
    %69 = vector.broadcast %64 : vector<4x1x128xf32> to vector<4x8x128xf32>
    %70 = arith.mulf %68, %69 : vector<4x8x128xf32>
    %71 = vector.broadcast %61 : vector<1x8x128xf32> to vector<4x8x128xf32>
    %72 = vector.broadcast %67 : vector<4x1x128xf32> to vector<4x8x128xf32>
    %73 = arith.mulf %71, %72 : vector<4x8x128xf32>
    %74 = arith.subf %70, %73 : vector<4x8x128xf32>
    %75 = arith.addf %49, %74 : vector<4x8x128xf32>
    %76 = vector.broadcast %59 : vector<1x8x128xf32> to vector<4x8x128xf32>
    %77 = vector.broadcast %67 : vector<4x1x128xf32> to vector<4x8x128xf32>
    %78 = arith.mulf %76, %77 : vector<4x8x128xf32>
    %79 = vector.broadcast %61 : vector<1x8x128xf32> to vector<4x8x128xf32>
    %80 = vector.broadcast %64 : vector<4x1x128xf32> to vector<4x8x128xf32>
    %81 = arith.mulf %79, %80 : vector<4x8x128xf32>
    %82 = arith.addf %78, %81 : vector<4x8x128xf32>
    %83 = arith.addf %57, %82 : vector<4x8x128xf32>
    %84 = vector.extract_strided_slice %3 {offsets = [24, 0], sizes = [8, 128], strides = [1, 1]} : vector<32x256xf32> to vector<8x128xf32>
    %85 = vector.shape_cast %84 : vector<8x128xf32> to vector<1x8x128xf32>
    %86 = vector.extract_strided_slice %3 {offsets = [24, 128], sizes = [8, 128], strides = [1, 1]} : vector<32x256xf32> to vector<8x128xf32>
    %87 = vector.shape_cast %86 : vector<8x128xf32> to vector<1x8x128xf32>
    %c3 = arith.constant 3 : index
    %c0_22 = arith.constant 0 : index
    %c0_23 = arith.constant 0 : index
    %88 = vector.load %arg3[%c3, %c0_22, %c0_23] : memref<4x4x128xf32, #tpu.memory_space<vmem>>, vector<1x4x128xf32>
    %89 = vector.shape_cast %88 : vector<1x4x128xf32> to vector<4x128xf32>
    %90 = vector.shape_cast %89 : vector<4x128xf32> to vector<4x1x128xf32>
    %c3_24 = arith.constant 3 : index
    %c0_25 = arith.constant 0 : index
    %c0_26 = arith.constant 0 : index
    %91 = vector.load %arg4[%c3_24, %c0_25, %c0_26] : memref<4x4x128xf32, #tpu.memory_space<vmem>>, vector<1x4x128xf32>
    %92 = vector.shape_cast %91 : vector<1x4x128xf32> to vector<4x128xf32>
    %93 = vector.shape_cast %92 : vector<4x128xf32> to vector<4x1x128xf32>
    %94 = vector.broadcast %85 : vector<1x8x128xf32> to vector<4x8x128xf32>
    %95 = vector.broadcast %90 : vector<4x1x128xf32> to vector<4x8x128xf32>
    %96 = arith.mulf %94, %95 : vector<4x8x128xf32>
    %97 = vector.broadcast %87 : vector<1x8x128xf32> to vector<4x8x128xf32>
    %98 = vector.broadcast %93 : vector<4x1x128xf32> to vector<4x8x128xf32>
    %99 = arith.mulf %97, %98 : vector<4x8x128xf32>
    %100 = arith.subf %96, %99 : vector<4x8x128xf32>
    %101 = arith.addf %75, %100 : vector<4x8x128xf32>
    %102 = vector.broadcast %85 : vector<1x8x128xf32> to vector<4x8x128xf32>
    %103 = vector.broadcast %93 : vector<4x1x128xf32> to vector<4x8x128xf32>
    %104 = arith.mulf %102, %103 : vector<4x8x128xf32>
    %105 = vector.broadcast %87 : vector<1x8x128xf32> to vector<4x8x128xf32>
    %106 = vector.broadcast %90 : vector<4x1x128xf32> to vector<4x8x128xf32>
    %107 = arith.mulf %105, %106 : vector<4x8x128xf32>
    %108 = arith.addf %104, %107 : vector<4x8x128xf32>
    %109 = arith.addf %83, %108 : vector<4x8x128xf32>
    %110 = vector.shape_cast %101 : vector<4x8x128xf32> to vector<32x128xf32>
    %111 = vector.shape_cast %109 : vector<4x8x128xf32> to vector<32x128xf32>
    %c0_27 = arith.constant 0 : index
    %c0_28 = arith.constant 0 : index
    %112 = vector.load %arg5[%c0_27, %c0_28] : memref<128x128xf32, #tpu.memory_space<vmem>>, vector<128x128xf32>
    %cst_29 = arith.constant dense<0.000000e+00> : vector<32x128xf32>
    %113 = tpu.matmul %110, %112, %cst_29 {dimension_numbers = #tpu.dot_dimension_numbers<[1], [0], [0], [1], [0, 0, 1, 1], [], []>} : vector<32x128xf32>, vector<128x128xf32>, vector<32x128xf32> -> vector<32x128xf32>
    %c0_30 = arith.constant 0 : index
    %c0_31 = arith.constant 0 : index
    %114 = vector.load %arg6[%c0_30, %c0_31] : memref<128x128xf32, #tpu.memory_space<vmem>>, vector<128x128xf32>
    %cst_32 = arith.constant dense<0.000000e+00> : vector<32x128xf32>
    %115 = tpu.matmul %111, %114, %cst_32 {dimension_numbers = #tpu.dot_dimension_numbers<[1], [0], [0], [1], [0, 0, 1, 1], [], []>} : vector<32x128xf32>, vector<128x128xf32>, vector<32x128xf32> -> vector<32x128xf32>
    %116 = arith.subf %113, %115 : vector<32x128xf32>
    %117 = vector.shape_cast %116 : vector<32x128xf32> to vector<4x8x128xf32>
    %c0_33 = arith.constant 0 : index
    %c0_34 = arith.constant 0 : index
    %c0_35 = arith.constant 0 : index
    %118 = vector.load %arg7[%c0_33, %c0_34, %c0_35] : memref<4x8x128xf32, #tpu.memory_space<vmem>>, vector<4x8x128xf32>
    tpu.vector_store %arg7[%c0_33, %c0_34, %c0_35], %117 {strides = array<i32>} : memref<4x8x128xf32, #tpu.memory_space<vmem>>, vector<4x8x128xf32>,
    return
  }
  func.func @transform_0(%arg0: i32) -> (i32, i32, i32) {
    %c0_i32 = arith.constant 0 : i32
    %c0_i32_0 = arith.constant 0 : i32
    %c0_i32_1 = arith.constant 0 : i32
    return %c0_i32, %arg0, %c0_i32_0 : i32, i32, i32
  }
  func.func @transform_1(%arg0: i32) -> (i32, i32) {
    %c0_i32 = arith.constant 0 : i32
    %c0_i32_0 = arith.constant 0 : i32
    %c0_i32_1 = arith.constant 0 : i32
    return %c0_i32, %c0_i32_0 : i32, i32
  }
  func.func @transform_2(%arg0: i32) -> (i32, i32, i32) {
    %c0_i32 = arith.constant 0 : i32
    %c0_i32_0 = arith.constant 0 : i32
    %c0_i32_1 = arith.constant 0 : i32
    %c0_i32_2 = arith.constant 0 : i32
    return %c0_i32, %c0_i32_0, %c0_i32_1 : i32, i32, i32
  }
  func.func @transform_3(%arg0: i32) -> (i32, i32, i32) {
    %c0_i32 = arith.constant 0 : i32
    %c0_i32_0 = arith.constant 0 : i32
    %c0_i32_1 = arith.constant 0 : i32
    %c0_i32_2 = arith.constant 0 : i32
    return %c0_i32, %c0_i32_0, %c0_i32_1 : i32, i32, i32
  }
  func.func @transform_4(%arg0: i32) -> (i32, i32) {
    %c0_i32 = arith.constant 0 : i32
    %c0_i32_0 = arith.constant 0 : i32
    %c0_i32_1 = arith.constant 0 : i32
    return %c0_i32, %c0_i32_0 : i32, i32
  }
  func.func @transform_5(%arg0: i32) -> (i32, i32) {
    %c0_i32 = arith.constant 0 : i32
    %c0_i32_0 = arith.constant 0 : i32
    %c0_i32_1 = arith.constant 0 : i32
    return %c0_i32, %c0_i32_0 : i32, i32
  }
  func.func @transform_6(%arg0: i32) -> (i32, i32, i32) {
    %c0_i32 = arith.constant 0 : i32
    %c0_i32_0 = arith.constant 0 : i32
    %c0_i32_1 = arith.constant 0 : i32
    return %c0_i32, %arg0, %c0_i32_0 : i32, i32, i32
  }
}

</mosaic_0001>

<bundles_post_ra>
// kernel: tpu_custom_call.1
= control target key start
LH: loop header
LB: loop body
LE: loop exit
PB: predicated region body
PF: predicated region fallthrough
CT: control target
= control target key end

     0   :  { %11 = vsyncpa [#allocation3], 0  ;;  %s1725_s0 = inlined_call_operand.hbm [shape: f32[4,8,128], index: 0, kind: input, shape index: {}]   ;;  %s1726_s1 = inlined_call_operand.hbm [shape: f32[128,256], index: 1, kind: input, shape index: {}]   ;;  %s1727_s2 = inlined_call_operand.hbm [shape: f32[4,4,128], index: 2, kind: input, shape index: {}]   ;;  %s1728_s3 = inlined_call_operand.hbm [shape: f32[4,4,128], index: 3, kind: input, shape index: {}]   ;;  %s1729_s4 = inlined_call_operand.hbm [shape: f32[128,128], index: 4, kind: input, shape index: {}]   ;;  %s1730_s5 = inlined_call_operand.hbm [shape: f32[128,128], index: 5, kind: input, shape index: {}]   ;;  %s1731_s6 = inlined_call_operand.hbm [shape: f32[4,8,128], index: 6, kind: output, shape index: {}]  }
   0x1   :  { %12 = vsyncpa [#allocation6], 0 }
   0x2   :  { %13 = vsyncpa [#allocation9], 0 }
   0x3   :  { %14 = vsyncpa [#allocation12], 0 }
   0x4   :  { %15 = vsyncpa [#allocation4], 0  ;;  %s1284_s21 = smov [#allocation5]  }
   0x5   :  { %s33_s22 = sshll.u32 %s1284_s21, 4  ;;  %s34_s22 = int_to_ptr.vmem [resolvable:$true] %s33_s22 }
   0x6   :  { %s1142_s23 = scalar_lea.vmem %s34_s22, 4096  ;;  %p1147_p1 = scmp.lt.s32.totalorder %s34_s22, %s34_s22 }
   0x7   :  { %p1143_p0 = scmp.ne.s32.totalorder %s34_s22, %s1142_s23  ;;  %p1148_p2 = scmp.lt.s32.totalorder %s1142_s23, %s1142_s23 }
   0x9   :  { %p1149_p3 = por %p1148_p2, %p1147_p1 }
   0xb   :  { %p1150_p4 = pnand %p1149_p3, %p1143_p0 }
   0xd   :  { %1153 = shalt.err (!%p1150_p4)
}
   0xe   :  { %s1285_s24 = smov 256   ;;  %s1286_s25 = smov 16  }
   0xf   :  { %39 = dma.hbm_to_vmem [thread:$0]  %s1726_s1, 4096, %s34_s22, [#allocation6], %s1285_s24, %s1285_s24, %s1286_s25  }
  0x10   :  { %s1287_s28 = smov [#allocation8]   ;;  %s1288_s30 = smov [#allocation2]  }
  0x11   :  { %s57_s29 = sshll.u32 %s1287_s28, 4  ;;  %s21_s7 = sshll.u32 %s1288_s30, 4  ;;  %s58_s29 = int_to_ptr.vmem [resolvable:$true] %s57_s29  ;;  %s22_s7 = int_to_ptr.vmem [resolvable:$true] %s21_s7 }
  0x12   :  { %s1162_s8 = scalar_lea.vmem %s58_s29, 256  ;;  %p1167_p6 = scmp.lt.s32.totalorder %s58_s29, %s58_s29 }
  0x13   :  { %p1163_p5 = scmp.ne.s32.totalorder %s58_s29, %s1162_s8  ;;  %p1168_p7 = scmp.lt.s32.totalorder %s1162_s8, %s1162_s8 }
  0x15   :  { %p1169_p8 = por %p1168_p7, %p1167_p6 }
  0x17   :  { %p1170_p9 = pnand %p1169_p8, %p1163_p5 }
  0x19   :  { %1173 = shalt.err (!%p1170_p9)
}
  0x1a   :  { %s1289_s9 = smov 64   ;;  %s1290_s10 = smov 4  }
  0x1b   :  { %63 = dma.hbm_to_vmem [thread:$0]  %s1728_s3, 256, %s58_s29, [#allocation9], %s1289_s9, %s1289_s9, %s1290_s10  }
  0x1c   :  { %s1182_s1 = scalar_lea.vmem %s22_s7, 512  ;;  %p1187_p11 = scmp.lt.s32.totalorder %s22_s7, %s22_s7 }
  0x1d   :  { %p1183_p10 = scmp.ne.s32.totalorder %s22_s7, %s1182_s1  ;;  %p1188_p12 = scmp.lt.s32.totalorder %s1182_s1, %s1182_s1 }
  0x1f   :  { %p1189_p13 = por %p1188_p12, %p1187_p11 }
  0x21   :  { %p1190_p0 = pnand %p1189_p13, %p1183_p10 }
  0x23   :  { %1193 = shalt.err (!%p1190_p0)
}
  0x24   :  { %s1291_s13 = smov 128   ;;  %s1292_s14 = smov 8  }
  0x25   :  { %27 = dma.hbm_to_vmem [thread:$0]  %s1725_s0, 512, %s22_s7, [#allocation3], %s1291_s13, %s1291_s13, %s1292_s14  }
  0x26   :  { %s1293_s17 = smov [#allocation7]   ;;  %s1294_s3 = smov [#allocation10]  }
  0x27   :  { %s45_s18 = sshll.u32 %s1293_s17, 4  ;;  %s69_s19 = sshll.u32 %s1294_s3, 4  ;;  %s46_s18 = int_to_ptr.vmem [resolvable:$true] %s45_s18  ;;  %s70_s19 = int_to_ptr.vmem [resolvable:$true] %s69_s19 }
  0x28   :  { %s1202_s20 = scalar_lea.vmem %s46_s18, 256  ;;  %p1207_p2 = scmp.lt.s32.totalorder %s46_s18, %s46_s18 }
  0x29   :  { %p1203_p1 = scmp.ne.s32.totalorder %s46_s18, %s1202_s20  ;;  %p1208_p3 = scmp.lt.s32.totalorder %s1202_s20, %s1202_s20 }
  0x2b   :  { %p1209_p4 = por %p1208_p3, %p1207_p2 }
  0x2d   :  { %p1210_p5 = pnand %p1209_p4, %p1203_p1 }
  0x2f   :  { %1213 = shalt.err (!%p1210_p5)
}
  0x30   :  { %51 = dma.hbm_to_vmem [thread:$0]  %s1727_s2, 256, %s46_s18, [#allocation6], %s1289_s9, %s1289_s9, %s1290_s10  }
  0x31   :  { %s1222_s23 = scalar_lea.vmem %s70_s19, 2048  ;;  %p1227_p7 = scmp.lt.s32.totalorder %s70_s19, %s70_s19 }
  0x32   :  { %p1223_p6 = scmp.ne.s32.totalorder %s70_s19, %s1222_s23  ;;  %p1228_p8 = scmp.lt.s32.totalorder %s1222_s23, %s1222_s23 }
  0x34   :  { %p1229_p9 = por %p1228_p8, %p1227_p7 }
  0x36   :  { %p1230_p10 = pnand %p1229_p9, %p1223_p6 }
  0x38   :  { %1233 = shalt.err (!%p1230_p10)
}
  0x39   :  { %75 = dma.hbm_to_vmem [thread:$0]  %s1729_s4, 2048, %s70_s19, [#allocation9], %s1291_s13, %s1291_s13, %s1292_s14  }
  0x3a   :  { %s1295_s25 = smov [#allocation11]  }
  0x3b   :  { %s81_s26 = sshll.u32 %s1295_s25, 4  ;;  %s82_s26 = int_to_ptr.vmem [resolvable:$true] %s81_s26 }
  0x3c   :  { %s1242_s27 = scalar_lea.vmem %s82_s26, 2048  ;;  %p1247_p12 = scmp.lt.s32.totalorder %s82_s26, %s82_s26 }
  0x3d   :  { %p1243_p11 = scmp.ne.s32.totalorder %s82_s26, %s1242_s27  ;;  %p1248_p13 = scmp.lt.s32.totalorder %s1242_s27, %s1242_s27 }
  0x3f   :  { %p1249_p0 = por %p1248_p13, %p1247_p12 }
  0x41   :  { %p1250_p1 = pnand %p1249_p0, %p1243_p11 }
  0x43   :  { %1253 = shalt.err (!%p1250_p1)
}
  0x44   :  { %87 = dma.hbm_to_vmem [thread:$0]  %s1730_s5, 2048, %s82_s26, [#allocation12], %s1291_s13, %s1291_s13, %s1292_s14  }
  0x45   :  { %1274 = dma.done.wait [#allocation3], 512  }
  0x46   :  { %1275 = vsyncadd [#allocation3], 4294966784 }
  0x47   :  { %1276 = dma.done.wait [#allocation6], 4352  }
  0x48   :  { %1277 = vsyncadd [#allocation6], 4294962944 }
  0x49   :  { %1278 = dma.done.wait [#allocation9], 2304  }
  0x4a   :  { %1279 = vsyncadd [#allocation9], 4294964992 }
  0x4b   :  { %1280 = dma.done.wait [#allocation12], 2048  }
  0x4c   :  { %1281 = vsyncadd [#allocation12], 4294965248  ;;  %v1296_v0 = vmov 0.0   ;;  %v141_v1 = vld [vmem:[#allocation5 + $0xf8] sm:$0xff]  ;;  %v140_v2 = vld [vmem:[#allocation5 + $0xf0] sm:$0xff]  ;;  %s1298_s4 = smov [#allocation13]  }
  0x4d   :  { %206 = vmatprep.mubr.f32.mxu0 %v1296_v0  ;;  %v139_v3 = vld [vmem:[#allocation5 + $0xe8] sm:$0xff]  ;;  %142 = vmatprep.subr.mxu0 %v141_v1  ;;  %v138_v4 = vld [vmem:[#allocation5 + $0xe0] sm:$0xff]  ;;  %v137_v5 = vld [vmem:[#allocation5 + $0xd8] sm:$0xff]  ;;  %s948_s5 = sshll.u32 %s1298_s4, 4  ;;  %s949_s5 = int_to_ptr.vmem [resolvable:$true] %s948_s5 }
  0x4e   :  { %143 = vmatpush1.msra.mxu0 %v140_v2  ;;  %v136_v6 = vld [vmem:[#allocation5 + $0xd0] sm:$0xff]  ;;  %v135_v7 = vld [vmem:[#allocation5 + $0xc8] sm:$0xff]  ;;  %v134_v8 = vld [vmem:[#allocation5 + $0xc0] sm:$0xff]  ;;  %s1254_s29 = scalar_lea.vmem %s949_s5, 512  ;;  %p1259_p3 = scmp.lt.s32.totalorder %s949_s5, %s949_s5 }
  0x4f   :  { %144 = vmatprep.subr.mxu0 %v139_v3  ;;  %v133_v9 = vld [vmem:[#allocation5 + $0xb8] sm:$0xff]  ;;  %v132_v10 = vld [vmem:[#allocation5 + $0xb0] sm:$0xff]  ;;  %v131_v11 = vld [vmem:[#allocation5 + $0xa8] sm:$0xff]  ;;  %p1255_p2 = scmp.ne.s32.totalorder %s949_s5, %s1254_s29  ;;  %p1260_p4 = scmp.lt.s32.totalorder %s1254_s29, %s1254_s29 }
  0x50   :  { %145 = vmatpush1.msra.mxu0 %v138_v4  ;;  %v130_v12 = vld [vmem:[#allocation5 + $0xa0] sm:$0xff]  ;;  %v129_v13 = vld [vmem:[#allocation5 + $0x98] sm:$0xff]  ;;  %v128_v14 = vld [vmem:[#allocation5 + $0x90] sm:$0xff] }
  0x51   :  { %146 = vmatprep.subr.mxu0 %v137_v5  ;;  %v127_v15 = vld [vmem:[#allocation5 + $0x88] sm:$0xff]  ;;  %v748_v16 = vld [vmem:[#allocation10 + $0x78] sm:$0xff]  ;;  %v747_v17 = vld [vmem:[#allocation10 + $0x70] sm:$0xff]  ;;  %v1297_v5 = vmov 1966171168   ;;  %p1261_p5 = por %p1260_p4, %p1259_p3 }
  0x52   :  { %147 = vmatpush1.msra.mxu0 %v136_v6  ;;  %v126_v18 = vld [vmem:[#allocation5 + $0x80] sm:$0xff]  ;;  %1011 = vmatprep.subr.mxu1 %v748_v16  ;;  %v125_v19 = vld [vmem:[#allocation5 + $0x78] sm:$0xff]  ;;  %v746_v20 = vld [vmem:[#allocation10 + $0x68] sm:$0xff]  ;;  %v242_v6 = vunpack.c.l.s4 %v1297_v5 }
  0x53   :  { %148 = vmatprep.subr.mxu0 %v135_v7  ;;  %1012 = vmatpush3.msra.mxu1 %v748_v16  ;;  %v124_v21 = vld [vmem:[#allocation5 + $0x70] sm:$0xff]  ;;  %v123_v22 = vld [vmem:[#allocation5 + $0x68] sm:$0xff]  ;;  %v745_v23 = vld [vmem:[#allocation10 + $0x60] sm:$0xff]  ;;  %v244_v7 = vlaneseq  ;;  %p1262_p6 = pnand %p1261_p5, %p1255_p2 }
  0x54   :  { %149 = vmatpush1.msra.mxu0 %v134_v8  ;;  %1013 = vmatprep.subr.mxu1 %v747_v17  ;;  %v122_v24 = vld [vmem:[#allocation5 + $0x60] sm:$0xff]  ;;  %v121_v25 = vld [vmem:[#allocation5 + $0x58] sm:$0xff]  ;;  %v120_v27 = vld [vmem:[#allocation5 + $0x50] sm:$0xff]  ;;  %v243_v8 = vunpack.c.0.s8 %v242_v6 }
  0x55   :  { %150 = vmatprep.subr.mxu0 %v133_v9  ;;  %1014 = vmatpush3.msra.mxu1 %v747_v17  ;;  %v744_v26 = vld [vmem:[#allocation10 + $0x58] sm:$0xff]  ;;  %v119_v28 = vld [vmem:[#allocation5 + $0x48] sm:$0xff]  ;;  %v743_v29 = vld [vmem:[#allocation10 + $0x50] sm:$0xff]  ;;  %v245_v9 = vshrl.u32 %v244_v7, 7 }
  0x56   :  { %151 = vmatpush1.msra.mxu0 %v132_v10  ;;  %1015 = vmatprep.subr.mxu1 %v746_v20  ;;  %v118_v30 = vld [vmem:[#allocation5 + $0x40] sm:$0xff]  ;;  %v117_v31 = vld [vmem:[#allocation5 + $0x38] sm:$0xff]  ;;  %v116_v32 = vld [vmem:[#allocation5 + $0x30] sm:$0xff] }
  0x57   :  { %152 = vmatprep.subr.mxu0 %v131_v11  ;;  %1016 = vmatpush3.msra.mxu1 %v746_v20  ;;  %v115_v33 = vld [vmem:[#allocation5 + $0x28] sm:$0xff]  ;;  %v114_v34 = vld [vmem:[#allocation5 + $0x20] sm:$0xff]  ;;  %v113_v35 = vld [vmem:[#allocation5 + $0x18] sm:$0xff]  ;;  %v246_v11 = vsub.s32 %v243_v8, %v245_v9 }
  0x58   :  { %153 = vmatpush1.msra.mxu0 %v130_v12  ;;  %1017 = vmatprep.subr.mxu1 %v745_v23  ;;  %v112_v36 = vld [vmem:[#allocation5 + $0x10] sm:$0xff]  ;;  %v111_v37 = vld [vmem:[#allocation5 + $0x8] sm:$0xff]  ;;  %v110_v38 = vld [vmem:[#allocation5] sm:$0xff] }
  0x59   :  { %154 = vmatprep.subr.mxu0 %v129_v13  ;;  %1018 = vmatpush3.msra.mxu1 %v745_v23  ;;  %v106_v39 = vld [vmem:[#allocation2] sm:$0xff]  ;;  %v1362_v40 = vld [vmem:[#allocation11 + $0x78] sm:$0xff]  ;;  %v1364_v41 = vld [vmem:[#allocation11 + $0x70] sm:$0xff] }
  0x5a   :  { %155 = vmatpush1.msra.mxu0 %v128_v14  ;;  %1019 = vmatprep.subr.mxu1 %v744_v26  ;;  %v107_v42 = vld [vmem:[#allocation2 + $0x8] sm:$0xff]  ;;  %v1373_v44 = vld [vmem:[#allocation11 + $0x60] sm:$0xff]  ;;  %v108_v45 = vld [vmem:[#allocation2 + $0x10] sm:$0xff] }
  0x5b   :  { %156 = vmatprep.subr.mxu0 %v127_v15  ;;  %1020 = vmatpush3.msra.mxu1 %v744_v26  ;;  %v1369_v43 = vld [vmem:[#allocation11 + $0x68] sm:$0xff]  ;;  %v1378_v46 = vld [vmem:[#allocation11 + $0x58] sm:$0xff]  ;;  %v1385_v48 = vld [vmem:[#allocation11 + $0x50] sm:$0xff] }
  0x5c   :  { %157 = vmatpush1.msra.mxu0 %v126_v18  ;;  %1021 = vmatprep.subr.mxu1 %v743_v29  ;;  %v109_v47 = vld [vmem:[#allocation2 + $0x18] sm:$0xff]  ;;  %v742_v49 = vld [vmem:[#allocation10 + $0x48] sm:$0xff]  ;;  %v741_v51 = vld [vmem:[#allocation10 + $0x40] sm:$0xff] }
  0x5d   :  { %158 = vmatprep.subr.mxu0 %v125_v19  ;;  %1022 = vmatpush3.msra.mxu1 %v743_v29  ;;  %v1389_v50 = vld [vmem:[#allocation11 + $0x48] sm:$0xff]  ;;  %v1393_v52 = vld [vmem:[#allocation11 + $0x40] sm:$0xff]  ;;  %v740_v53 = vld [vmem:[#allocation10 + $0x38] sm:$0xff]  ;;  %v1430_v19 = vsub.s32 0, %v245_v9 }
  0x5e   :  { %159 = vmatpush1.msra.mxu0 %v124_v21  ;;  %1023 = vmatprep.subr.mxu1 %v742_v49  ;;  %1752 = vst [vmem:[#allocation19_spill] sm:$0xff] %v1393_v52  ;;  %v1397_v54 = vld [vmem:[#allocation11 + $0x38] sm:$0xff]  ;;  %v739_v55 = vld [vmem:[#allocation10 + $0x30] sm:$0xff]  ;;  %v738_v57 = vld [vmem:[#allocation10 + $0x28] sm:$0xff] }
  0x5f   :  { %160 = vmatprep.subr.mxu0 %v123_v22  ;;  %1024 = vmatpush3.msra.mxu1 %v742_v49  ;;  %1753 = vst [vmem:[#allocation20_spill] sm:$0xff] %v1397_v54  ;;  %v1401_v56 = vld [vmem:[#allocation11 + $0x30] sm:$0xff]  ;;  %v1405_v58 = vld [vmem:[#allocation11 + $0x28] sm:$0xff]  ;;  %v737_v59 = vld [vmem:[#allocation10 + $0x20] sm:$0xff] }
  0x60   :  { %161 = vmatpush1.msra.mxu0 %v122_v24  ;;  %1025 = vmatprep.subr.mxu1 %v741_v51  ;;  %1754 = vst [vmem:[#allocation21_spill] sm:$0xff] %v1401_v56  ;;  %1755 = vst [vmem:[#allocation22_spill] sm:$0xff] %v1405_v58  ;;  %v1409_v60 = vld [vmem:[#allocation11 + $0x20] sm:$0xff]  ;;  %v736_v61 = vld [vmem:[#allocation10 + $0x18] sm:$0xff] }
  0x61   :  { %162 = vmatprep.subr.mxu0 %v121_v25  ;;  %1026 = vmatpush3.msra.mxu1 %v741_v51  ;;  %1756 = vst [vmem:[#allocation23_spill] sm:$0xff] %v1409_v60  ;;  %v1413_v62 = vld [vmem:[#allocation11 + $0x18] sm:$0xff]  ;;  %v735_v63 = vld [vmem:[#allocation10 + $0x10] sm:$0xff]  ;;  %v734_v1 = vld [vmem:[#allocation10 + $0x8] sm:$0xff] }
  0x62   :  { %163 = vmatpush1.msra.mxu0 %v120_v27  ;;  %1027 = vmatprep.subr.mxu1 %v740_v53  ;;  %1757 = vst [vmem:[#allocation24_spill] sm:$0xff] %v1413_v62  ;;  %v1419_v2 = vld [vmem:[#allocation11 + $0x8] sm:$0xff]  ;;  %v733_v3 = vld [vmem:[#allocation10] sm:$0xff] }
  0x63   :  { %164 = vmatprep.subr.mxu0 %v119_v28  ;;  %1028 = vmatpush3.msra.mxu1 %v740_v53  ;;  %1759 = vst [vmem:[#allocation26_spill] sm:$0xff] %v1419_v2  ;;  %v1423_v4 = vld [vmem:[#allocation11] sm:$0xff]  ;;  %v964_v12 = vld.sshfl [vmem:[#allocation8] sm:$0x33 pattern:$0x75316420] }
  0x64   :  { %165 = vmatpush1.msra.mxu0 %v118_v30  ;;  %1029 = vmatprep.subr.mxu1 %v739_v55  ;;  %1760 = vst [vmem:[#allocation27_spill] sm:$0xff] %v1423_v4  ;;  %v963_v10 = vld.sshfl [vmem:[#allocation7] sm:$0x33 pattern:$0x75316420]  ;;  %v266_v15 = vcombine.high %v964_v12, %v964_v12  ;;  %v273_v18 = vrot.slane %v964_v12, %v246_v11 }
  0x65   :  { %166 = vmatprep.subr.mxu0 %v117_v31  ;;  %1030 = vmatpush3.msra.mxu1 %v739_v55  ;;  %v965_v13 = vld.sshfl [vmem:[#allocation7 + $0x4] sm:$0x33 pattern:$0x75316420]  ;;  %v240_v14 = vcombine.high %v963_v10, %v963_v10  ;;  %v247_v17 = vrot.slane %v963_v10, %v246_v11 }
  0x66   :  { %167 = vmatpush1.msra.mxu0 %v116_v32  ;;  %1031 = vmatprep.subr.mxu1 %v738_v57  ;;  %v966_v16 = vld.sshfl [vmem:[#allocation8 + $0x4] sm:$0x33 pattern:$0x75316420]  ;;  %v365_v20 = vcombine.high %v965_v13, %v965_v13  ;;  %v372_v23 = vrot.slane %v965_v13, %v246_v11  ;;  %v280_v27 = vrot.slane %v266_v15, %v246_v11 }
  0x67   :  { %168 = vmatprep.subr.mxu0 %v115_v33  ;;  %1032 = vmatpush3.msra.mxu1 %v738_v57  ;;  %v392_v21 = vcombine.high %v966_v16, %v966_v16  ;;  %v967_v22 = vld.sshfl [vmem:[#allocation7 + $0x8] sm:$0x33 pattern:$0x75316420]  ;;  %v399_v24 = vrot.slane %v966_v16, %v246_v11  ;;  %v254_v26 = vrot.slane %v240_v14, %v246_v11 }
  0x68   :  { %169 = vmatpush1.msra.mxu0 %v114_v34  ;;  %1033 = vmatprep.subr.mxu1 %v737_v59  ;;  %v968_v25 = vld.sshfl [vmem:[#allocation8 + $0x8] sm:$0x33 pattern:$0x75316420]  ;;  %v255_v28 = vcombine.high %v247_v17, %v247_v17  ;;  %v281_v29 = vcombine.high %v273_v18, %v273_v18  ;;  %v1433_v30 = vrot.slane %v247_v17, %v1430_v19 }
  0x69   :  { %170 = vmatprep.subr.mxu0 %v113_v35  ;;  %1034 = vmatpush3.msra.mxu1 %v737_v59  ;;  %v969_v31 = vld.sshfl [vmem:[#allocation7 + $0xc] sm:$0x33 pattern:$0x75316420]  ;;  %v1436_v32 = vrot.slane %v273_v18, %v1430_v19  ;;  %v1439_v33 = vrot.slane %v254_v26, %v1430_v19  ;;  %v1442_v34 = vrot.slane %v280_v27, %v1430_v19 }
  0x6a   :  { %171 = vmatpush1.msra.mxu0 %v112_v36  ;;  %1035 = vmatprep.subr.mxu1 %v736_v61  ;;  %v379_v35 = vrot.slane %v365_v20, %v246_v11  ;;  %v491_v36 = vcombine.high %v967_v22, %v967_v22  ;;  %v525_v49 = vrot.slane %v968_v25, %v246_v11 }
  0x6b   :  { %172 = vmatprep.subr.mxu0 %v111_v37  ;;  %1036 = vmatpush3.msra.mxu1 %v736_v61  ;;  %v498_v37 = vrot.slane %v967_v22, %v246_v11  ;;  %v617_v51 = vcombine.high %v969_v31, %v969_v31  ;;  %v1445_v53 = vrot.slane %v372_v23, %v1430_v19 }
  0x6c   :  { %173 = vmatpush1.msra.mxu0 %v110_v38  ;;  %1037 = vmatprep.subr.mxu1 %v735_v63  ;;  %v518_v38 = vcombine.high %v968_v25, %v968_v25  ;;  %v1448_v55 = vrot.slane %v399_v24, %v1430_v19  ;;  %v1451_v57 = vrot.slane %v255_v28, %v1430_v19 }
  0x6d   :  { %207 = vmatmul.mubr.f32.vlgmr.msra.gmra.mxu0 %v106_v39  ;;  %1049 = vmatprep.subr.mxu0 %v1362_v40  ;;  %v970_v39 = vld.sshfl [vmem:[#allocation8 + $0xc] sm:$0x33 pattern:$0x75316420]  ;;  %v1454_v59 = vrot.slane %v281_v29, %v1430_v19  ;;  %v624_v61 = vrot.slane %v969_v31, %v246_v11  ;;  %v506_v5 = vcombine.high %v498_v37, %v498_v37 }
  0x6e   :  { %212 = vmatprep.mubr.f32.mxu0 %v1296_v0  ;;  %1050 = vmatpush3.msra.mxu0 %v1362_v40  ;;  %v651_v6 = vrot.slane %v970_v39, %v246_v11  ;;  %v505_v7 = vrot.slane %v491_v36, %v246_v11  ;;  %v532_v8 = vrot.slane %v518_v38, %v246_v11 }
  0x6f   :  { %1051 = vmatprep.subr.mxu0 %v1364_v41  ;;  %1038 = vmatpush3.msra.mxu1 %v735_v63  ;;  %v644_v63 = vcombine.high %v970_v39, %v970_v39  ;;  %v533_v9 = vcombine.high %v525_v49, %v525_v49  ;;  %v1463_v10 = vrot.slane %v498_v37, %v1430_v19 }
  0x70   :  { %1052 = vmatpush3.msra.mxu0 %v1364_v41  ;;  %1039 = vmatprep.subr.mxu1 %v734_v1  ;;  %v1466_v12 = vrot.slane %v525_v49, %v1430_v19  ;;  %v631_v13 = vrot.slane %v617_v51, %v246_v11  ;;  %v1469_v14 = vrot.slane %v505_v7, %v1430_v19 }
  0x71   :  { %213 = vmatmul.mubr.f32.gmra.mxu0 %v107_v42  ;;  %1053 = vmatprep.subr.mxu0 %v1369_v43  ;;  %v406_v42 = vrot.slane %v392_v21, %v246_v11  ;;  %v1472_v15 = vrot.slane %v532_v8, %v1430_v19  ;;  %v256_v16 = vcombine.high %v254_v26, %v254_v26 }
  0x72   :  { %218 = vmatprep.mubr.f32.mxu0 %v1296_v0  ;;  %1054 = vmatpush3.msra.mxu0 %v1369_v43  ;;  %v282_v17 = vcombine.high %v280_v27, %v280_v27  ;;  %v632_v18 = vcombine.high %v624_v61, %v624_v61  ;;  %v1474_v20 = vrot.slane %v644_v63, %v246_v11 }
  0x73   :  { %1055 = vmatprep.subr.mxu0 %v1373_v44  ;;  %1040 = vmatpush3.msra.mxu1 %v734_v1  ;;  %v1457_v1 = vrot.slane %v379_v35, %v1430_v19  ;;  %v381_v21 = vcombine.high %v379_v35, %v379_v35  ;;  %v408_v22 = vcombine.high %v406_v42, %v406_v42 }
  0x74   :  { %1056 = vmatpush3.msra.mxu0 %v1373_v44  ;;  %1041 = vmatprep.subr.mxu1 %v733_v3  ;;  %v507_v25 = vcombine.high %v505_v7, %v505_v7  ;;  %v534_v28 = vcombine.high %v532_v8, %v532_v8  ;;  %v1480_v29 = vrot.slane %v624_v61, %v1430_v19 }
  0x75   :  { %219 = vmatmul.mubr.f32.gmra.mxu0 %v108_v45  ;;  %1057 = vmatprep.subr.mxu0 %v1378_v46  ;;  %v380_v45 = vcombine.high %v372_v23, %v372_v23  ;;  %v659_v23 = vcombine.high %v651_v6, %v651_v6  ;;  %v1483_v31 = vrot.slane %v651_v6, %v1430_v19 }
  0x76   :  { %224 = vmatprep.mubr.f32.mxu0 %v1296_v0  ;;  %1058 = vmatpush3.msra.mxu0 %v1378_v46  ;;  %v1416_v0 = vld [vmem:[#allocation11 + $0x10] sm:$0xff]  ;;  %v633_v27 = vcombine.high %v631_v13, %v631_v13  ;;  %v1489_v11 = vrot.slane %v631_v13, %v1430_v19  ;;  %v1493_v35 = vrot.slane %v1474_v20, %v1430_v19 }
  0x77   :  { %1059 = vmatprep.subr.mxu0 %v1385_v48  ;;  %1758 = vst [vmem:[#allocation25_spill] sm:$0xff] %v1416_v0  ;;  %1042 = vmatpush3.msra.mxu1 %v733_v3  ;;  %v1460_v3 = vrot.slane %v406_v42, %v1430_v19  ;;  %v1496_v36 = vrot.slane %v256_v16, %v1430_v19 }
  0x78   :  { %1060 = vmatpush3.msra.mxu0 %v1385_v48  ;;  %1087 = vmatprep.subr.mxu1 %v1362_v40  ;;  %v1499_v37 = vrot.slane %v282_v17, %v1430_v19  ;;  %v1504_v39 = vrot.slane %v506_v5, %v1430_v19  ;;  %v1507_v42 = vrot.slane %v533_v9, %v1430_v19 }
  0x79   :  { %225 = vmatmul.mubr.f32.gmra.mxu0 %v109_v47  ;;  %1061 = vmatprep.subr.mxu0 %v1389_v50  ;;  %v407_v47 = vcombine.high %v399_v24, %v399_v24  ;;  %v1477_v24 = vrot.slane %v380_v45, %v1430_v19  ;;  %1761 = vst [vmem:[#allocation28_spill] sm:$0xff] %v1496_v36 }
  0x7a   :  { %1062 = vmatpush3.msra.mxu0 %v1389_v50  ;;  %1762 = vst [vmem:[#allocation29_spill] sm:$0xff] %v1499_v37  ;;  %v1510_v45 = vrot.slane %v381_v21, %v1430_v19  ;;  %v1516_v49 = vrot.slane %v632_v18, %v1430_v19  ;;  %v1519_v51 = vrot.slane %v659_v23, %v1430_v19 }
  0x7b   :  { %1063 = vmatprep.subr.mxu0 %v1393_v52  ;;  %v1486_v26 = vrot.slane %v407_v47, %v1430_v19  ;;  %v1513_v47 = vrot.slane %v408_v22, %v1430_v19  ;;  %v1522_v61 = vrot.slane %v507_v25, %v1430_v19  ;;  %v1525_v63 = vrot.slane %v534_v28, %v1430_v19 }
  0x7c   :  { %1064 = vmatpush3.msra.mxu0 %v1393_v52  ;;  %v1536_v9 = vrot.slane %v633_v27, %v1430_v19 }
  0x7d   :  { %1065 = vmatprep.subr.mxu0 %v1397_v54 }
  0x7e   :  { %1066 = vmatpush3.msra.mxu0 %v1397_v54 }
  0x7f   :  { %1067 = vmatprep.subr.mxu0 %v1401_v56 }
  0x80   :  { %1068 = vmatpush3.msra.mxu0 %v1401_v56 }
  0x81   :  { %1069 = vmatprep.subr.mxu0 %v1405_v58 }
  0x82   :  { %1070 = vmatpush3.msra.mxu0 %v1405_v58 }
  0x83   :  { %1071 = vmatprep.subr.mxu0 %v1409_v60 }
  0x84   :  { %1072 = vmatpush3.msra.mxu0 %v1409_v60 }
  0x85   :  { %1073 = vmatprep.subr.mxu0 %v1413_v62 }
  0x86   :  { %1074 = vmatpush3.msra.mxu0 %v1413_v62 }
  0x87   :  { %1075 = vmatprep.subr.mxu0 %v1416_v0 }
  0x88   :  { %1076 = vmatpush3.msra.mxu0 %v1416_v0 }
  0x89   :  { %1077 = vmatprep.subr.mxu0 %v1419_v2 }
  0x8a   :  { %1078 = vmatpush3.msra.mxu0 %v1419_v2 }
  0x8b   :  { %1079 = vmatprep.subr.mxu0 %v1423_v4 }
  0x8c   :  { %1080 = vmatpush3.msra.mxu0 %v1423_v4 }
 0x12d   :  { %v1501_v38 = vpop.f32.mrf.mxu0 }
 0x12e   :  { %v303_v6 = vmul.f32 %v1433_v30, %v1501_v38  ;;  %v339_v7 = vmul.f32 %v1436_v32, %v1501_v38  ;;  %v304_v17 = vmul.f32 %v1439_v33, %v1501_v38  ;;  %v340_v22 = vmul.f32 %v1442_v34, %v1501_v38 }
 0x12f   :  { %v1527_v5 = vpop.f32.mrf.mxu0  ;;  %v1564_v27 = vmul.f32 %v1496_v36, %v1501_v38 }
 0x130   :  { %v327_v13 = vmul.f32 %v1436_v32, %v1527_v5  ;;  %v343_v16 = vmul.f32 %v1433_v30, %v1527_v5  ;;  %v328_v18 = vmul.f32 %v1442_v34, %v1527_v5  ;;  %v344_v23 = vmul.f32 %v1439_v33, %v1527_v5 }
 0x131   :  { %v1546_v21 = vpop.f32.mrf.mxu0  ;;  %v1554_v32 = vmul.f32 %v1451_v57, %v1501_v38  ;;  %v1558_v30 = vmul.f32 %v1454_v59, %v1527_v5  ;;  %v1568_v34 = vmul.f32 %v1499_v37, %v1527_v5 }
 0x132   :  { %v331_v25 = vsub.f32 %v303_v6, %v327_v13  ;;  %v429_v28 = vmul.f32 %v1445_v53, %v1546_v21  ;;  %v347_v8 = vadd.f32 %v343_v16, %v339_v7  ;;  %v465_v4 = vmul.f32 %v1448_v55, %v1546_v21 }
 0x133   :  { %v1570_v33 = vpop.f32.mrf.mxu0  ;;  %v332_v2 = vsub.f32 %v304_v17, %v328_v18  ;;  %v430_v6 = vmul.f32 %v1457_v1, %v1546_v21  ;;  %v466_v16 = vmul.f32 %v1460_v3, %v1546_v21  ;;  %v348_v17 = vadd.f32 %v344_v23, %v340_v22 }
 0x134   :  { %v453_v13 = vmul.f32 %v1448_v55, %v1570_v33  ;;  %v469_v0 = vmul.f32 %v1445_v53, %v1570_v33  ;;  %v454_v62 = vmul.f32 %v1460_v3, %v1570_v33  ;;  %v470_v60 = vmul.f32 %v1457_v1, %v1570_v33 }
 0x135   :  { %v1584_v7 = vpop.f32.mrf.mxu0  ;;  %v333_v18 = vsub.f32 %v1554_v32, %v1558_v30  ;;  %v431_v55 = vmul.f32 %v1477_v24, %v1546_v21  ;;  %v455_v1 = vmul.f32 %v1486_v26, %v1570_v33 }
 0x136   :  { %v457_v37 = vsub.f32 %v429_v28, %v453_v13  ;;  %v555_v53 = vmul.f32 %v1463_v10, %v1584_v7  ;;  %v473_v58 = vadd.f32 %v469_v0, %v465_v4  ;;  %v591_v3 = vmul.f32 %v1466_v12, %v1584_v7 }
 0x137   :  { %v1596_v36 = vpop.f32.mrf.mxu0  ;;  %v458_v22 = vsub.f32 %v430_v6, %v454_v62  ;;  %v556_v23 = vmul.f32 %v1469_v14, %v1584_v7  ;;  %v474_v32 = vadd.f32 %v470_v60, %v466_v16  ;;  %v592_v4 = vmul.f32 %v1472_v15, %v1584_v7 }
 0x138   :  { %v461_v30 = vadd.f32 %v457_v37, %v331_v25  ;;  %v579_v28 = vmul.f32 %v1466_v12, %v1596_v36  ;;  %v595_v0 = vmul.f32 %v1463_v10, %v1596_v36  ;;  %v477_v56 = vadd.f32 %v473_v58, %v347_v8 }
 0x139   :  { %v1608_v13 = vpop.f32.mrf.mxu0  ;;  %v462_v54 = vadd.f32 %v458_v22, %v332_v2  ;;  %v580_v62 = vmul.f32 %v1472_v15, %v1596_v36  ;;  %v596_v60 = vmul.f32 %v1469_v14, %v1596_v36  ;;  %v478_v6 = vadd.f32 %v474_v32, %v348_v17 }
 0x13a   :  { %v583_v37 = vsub.f32 %v555_v53, %v579_v28  ;;  %v681_v12 = vmul.f32 %v1480_v29, %v1608_v13  ;;  %v599_v25 = vadd.f32 %v595_v0, %v591_v3  ;;  %v717_v16 = vmul.f32 %v1483_v31, %v1608_v13 }
 0x13b   :  { %v1616_v10 = vpop.f32.mrf.mxu0  ;;  %v584_v52 = vsub.f32 %v556_v23, %v580_v62  ;;  %v682_v58 = vmul.f32 %v1489_v11, %v1608_v13  ;;  %v600_v2 = vadd.f32 %v596_v60, %v592_v4  ;;  %v718_v17 = vmul.f32 %v1493_v35, %v1608_v13 }
 0x13c   :  { %v587_v15 = vadd.f32 %v583_v37, %v461_v30  ;;  %v705_v14 = vmul.f32 %v1483_v31, %v1616_v10  ;;  %v721_v8 = vmul.f32 %v1480_v29, %v1616_v10  ;;  %v603_v53 = vadd.f32 %v599_v25, %v477_v56 }
 0x13d   :  { %v588_v3 = vadd.f32 %v584_v52, %v462_v54  ;;  %v706_v22 = vmul.f32 %v1493_v35, %v1616_v10  ;;  %v722_v23 = vmul.f32 %v1489_v11, %v1616_v10  ;;  %v604_v30 = vadd.f32 %v600_v2, %v478_v6 }
 0x13e   :  { %v709_v32 = vsub.f32 %v681_v12, %v705_v14  ;;  %v725_v28 = vadd.f32 %v721_v8, %v717_v16  ;;  %v459_v0 = vsub.f32 %v431_v55, %v455_v1  ;;  %v557_v29 = vmul.f32 %v1504_v39, %v1584_v7 }
 0x13f   :  { %v710_v4 = vsub.f32 %v682_v58, %v706_v22  ;;  %v726_v31 = vadd.f32 %v722_v23, %v718_v17  ;;  %v581_v62 = vmul.f32 %v1507_v42, %v1596_v36  ;;  %v683_v54 = vmul.f32 %v1516_v49, %v1608_v13 }
 0x140   :  { %v713_v56 = vadd.f32 %v709_v32, %v587_v15  ;;  %v729_v52 = vadd.f32 %v725_v28, %v603_v53  ;;  %v707_v11 = vmul.f32 %v1519_v51, %v1616_v10  ;;  %v463_v37 = vadd.f32 %v459_v0, %v333_v18 }
 0x141   :  { %v714_v35 = vadd.f32 %v710_v4, %v588_v3  ;;  %v730_v60 = vadd.f32 %v726_v31, %v604_v30  ;;  %v585_v55 = vsub.f32 %v557_v29, %v581_v62  ;;  %v432_v12 = vmul.f32 %v1510_v45, %v1546_v21  ;;  %v1768_v29 = vld [vmem:[#allocation22_spill] sm:$0xff]  ;;  %v1769_v62 = vld [vmem:[#allocation29_spill] sm:$0xff] }
 0x142   :  { %1043 = vmatprep.mubr.f32.mxu1 %v713_v56  ;;  %1081 = vmatprep.mubr.f32.mxu0 %v729_v52  ;;  %v711_v1 = vsub.f32 %v683_v54, %v707_v11  ;;  %v456_v25 = vmul.f32 %v1513_v47, %v1570_v33  ;;  %v1763_v16 = vcombine.high %v1474_v20, %v1474_v20 }
 0x143   :  { %1044 = vmatmul.mubr.f32.vlgmr.msra.gmra.mxu1 %v714_v35  ;;  %1082 = vmatmul.mubr.f32.vlgmr.msra.gmra.mxu0 %v730_v60  ;;  %v589_v6 = vadd.f32 %v585_v55, %v463_v37  ;;  %v334_v18 = vsub.f32 %v1564_v27, %v1568_v34  ;;  %v558_v15 = vmul.f32 %v1522_v61, %v1584_v7 }
 0x144   :  { %v700_v58 = vrot.slane %v1763_v16, %v1430_v19  ;;  %1103 = vmatpush3.msra.mxu1 %v1362_v40  ;;  %v460_v2 = vsub.f32 %v432_v12, %v456_v25  ;;  %v582_v14 = vmul.f32 %v1525_v63, %v1596_v36  ;;  %v684_v17 = vmul.f32 %v1536_v9, %v1608_v13 }
 0x145   :  { %v715_v8 = vadd.f32 %v711_v1, %v589_v6  ;;  %1088 = vmatprep.subr.mxu1 %v1364_v41  ;;  %v345_v40 = vmul.f32 %v1451_v57, %v1527_v5  ;;  %v341_v34 = vmul.f32 %v1454_v59, %v1501_v38  ;;  %v467_v3 = vmul.f32 %v1486_v26, %v1546_v21 }
 0x146   :  { %v708_v19 = vmul.f32 %v700_v58, %v1616_v10  ;;  %1104 = vmatpush3.msra.mxu1 %v1364_v41  ;;  %v464_v20 = vadd.f32 %v460_v2, %v334_v18  ;;  %v586_v27 = vsub.f32 %v558_v15, %v582_v14  ;;  %v471_v22 = vmul.f32 %v1477_v24, %v1570_v33 }
 0x147   :  { %1046 = vmatprep.mubr.f32.mxu1 %v715_v8  ;;  %1089 = vmatprep.subr.mxu1 %v1369_v43  ;;  %v593_v41 = vmul.f32 %v1507_v42, %v1584_v7  ;;  %v597_v57 = vmul.f32 %v1504_v39, %v1596_v36  ;;  %v349_v59 = vadd.f32 %v345_v40, %v341_v34 }
 0x148   :  { %v712_v53 = vsub.f32 %v684_v17, %v708_v19  ;;  %v590_v23 = vadd.f32 %v586_v27, %v464_v20  ;;  %1105 = vmatpush3.msra.mxu1 %v1369_v43  ;;  %v475_v32 = vadd.f32 %v471_v22, %v467_v3  ;;  %v719_v28 = vmul.f32 %v1519_v51, %v1608_v13  ;;  %v1766_v51 = vld [vmem:[#allocation21_spill] sm:$0xff] }
 0x149   :  { %1090 = vmatprep.subr.mxu1 %v1373_v44  ;;  %v723_v26 = vmul.f32 %v1516_v49, %v1616_v10  ;;  %v601_v30 = vadd.f32 %v597_v57, %v593_v41  ;;  %v1764_v49 = vld [vmem:[#allocation19_spill] sm:$0xff]  ;;  %v598_v31 = vmul.f32 %v1522_v61, %v1596_v36  ;;  %v724_v56 = vmul.f32 %v1536_v9, %v1616_v10  ;;  %v1773_v9 = vld [vmem:[#allocation26_spill] sm:$0xff] }
 0x14a   :  { %v716_v24 = vadd.f32 %v712_v53, %v590_v23  ;;  %1106 = vmatpush3.msra.mxu1 %v1373_v44  ;;  %v479_v43 = vadd.f32 %v475_v32, %v349_v59  ;;  %v1765_v44 = vld [vmem:[#allocation20_spill] sm:$0xff]  ;;  %v720_v36 = vmul.f32 %v700_v58, %v1608_v13  ;;  %v1774_v10 = vld [vmem:[#allocation27_spill] sm:$0xff] }
 0x14b   :  { %v727_v0 = vadd.f32 %v723_v26, %v719_v28  ;;  %1091 = vmatprep.subr.mxu1 %v1378_v46 }
 0x14c   :  { %1047 = vmatmul.mubr.f32.gmra.mxu1 %v716_v24  ;;  %v605_v39 = vadd.f32 %v601_v30, %v479_v43 }
 0x14d   :  { %1107 = vmatpush3.msra.mxu1 %v1378_v46  ;;  %v472_v46 = vmul.f32 %v1510_v45, %v1570_v33  ;;  %v342_v45 = vmul.f32 %v1769_v62, %v1501_v38  ;;  %v594_v33 = vmul.f32 %v1525_v63, %v1584_v7  ;;  %v1772_v38 = vld [vmem:[#allocation25_spill] sm:$0xff]  ;;  %v728_v63 = vadd.f32 %v724_v56, %v720_v36 }
 0x14e   :  { %1092 = vmatprep.subr.mxu1 %v1385_v48  ;;  %v731_v42 = vadd.f32 %v727_v0, %v605_v39 }
 0x14f   :  { %1108 = vmatpush3.msra.mxu1 %v1385_v48  ;;  %v1767_v48 = vld [vmem:[#allocation28_spill] sm:$0xff] }
 0x150   :  { %1093 = vmatprep.subr.mxu1 %v1389_v50  ;;  %1084 = vmatprep.mubr.f32.mxu1 %v731_v42  ;;  %v346_v4 = vmul.f32 %v1767_v48, %v1527_v5  ;;  %v1770_v5 = vld [vmem:[#allocation23_spill] sm:$0xff] }
 0x151   :  { %1109 = vmatpush3.msra.mxu1 %v1389_v50  ;;  %v468_v50 = vmul.f32 %v1513_v47, %v1546_v21  ;;  %v1771_v47 = vld [vmem:[#allocation24_spill] sm:$0xff]  ;;  %v602_v21 = vadd.f32 %v598_v31, %v594_v33 }
 0x152   :  { %1094 = vmatprep.subr.mxu1 %v1764_v49  ;;  %v350_v61 = vadd.f32 %v346_v4, %v342_v45 }
 0x153   :  { %1110 = vmatpush3.msra.mxu1 %v1764_v49  ;;  %v476_v52 = vadd.f32 %v472_v46, %v468_v50 }
 0x154   :  { %1095 = vmatprep.subr.mxu1 %v1765_v44 }
 0x155   :  { %1111 = vmatpush3.msra.mxu1 %v1765_v44  ;;  %v480_v54 = vadd.f32 %v476_v52, %v350_v61 }
 0x156   :  { %1096 = vmatprep.subr.mxu1 %v1766_v51 }
 0x157   :  { %1112 = vmatpush3.msra.mxu1 %v1766_v51  ;;  %v606_v7 = vadd.f32 %v602_v21, %v480_v54 }
 0x158   :  { %1097 = vmatprep.subr.mxu1 %v1768_v29 }
 0x159   :  { %1113 = vmatpush3.msra.mxu1 %v1768_v29  ;;  %v732_v13 = vadd.f32 %v728_v63, %v606_v7 }
 0x15a   :  { %1098 = vmatprep.subr.mxu1 %v1770_v5 }
 0x15b   :  { %1114 = vmatpush3.msra.mxu1 %v1770_v5 }
 0x15c   :  { %1099 = vmatprep.subr.mxu1 %v1771_v47 }
 0x15d   :  { %1115 = vmatpush3.msra.mxu1 %v1771_v47 }
 0x15e   :  { %1100 = vmatprep.subr.mxu1 %v1772_v38 }
 0x15f   :  { %1116 = vmatpush3.msra.mxu1 %v1772_v38 }
 0x160   :  { %1101 = vmatprep.subr.mxu1 %v1773_v9 }
 0x161   :  { %1117 = vmatpush3.msra.mxu1 %v1773_v9 }
 0x162   :  { %1102 = vmatprep.subr.mxu1 %v1774_v10 }
 0x163   :  { %1118 = vmatpush3.msra.mxu1 %v1774_v10 }
 0x164   :  { %1085 = vmatmul.mubr.f32.vlgmr.msra.gmra.mxu1 %v732_v13 }
 0x203   :  { %v1045_v11 = vpop.f32.mrf.mxu1  ;;  %v1083_v35 = vpop.f32.mrf.mxu0 }
 0x204   :  { %v936_v60 = vsub.f32 %v1045_v11, %v1083_v35 }
 0x205   :  { %v815_v37 = vpop.f32.mrf.mxu1  ;;  %v916_v55 = vpop.f32.mrf.mxu0 }
 0x206   :  { %940 = vst [vmem:[#allocation13 + $0x8] sm:$0xff] %v936_v60  ;;  %v935_v1 = vsub.f32 %v815_v37, %v916_v55 }
 0x208   :  { %939 = vst [vmem:[#allocation13] sm:$0xff] %v935_v1 }
 0x20c   :  { %v1048_v12 = vpop.f32.mrf.mxu1 }
 0x20e   :  { %v825_v25 = vpop.f32.mrf.mxu1 }
 0x224   :  { %v1086_v6 = vpop.f32.mrf.mxu1 }
 0x225   :  { %v938_v16 = vsub.f32 %v1048_v12, %v1086_v6 }
 0x226   :  { %v926_v58 = vpop.f32.mrf.mxu1 }
 0x227   :  { %942 = vst [vmem:[#allocation13 + $0x18] sm:$0xff] %v938_v16  ;;  %v937_v18 = vsub.f32 %v825_v25, %v926_v58 }
 0x229   :  { %941 = vst [vmem:[#allocation13 + $0x10] sm:$0xff] %v937_v18 }
 0x22a   :  { %1265 = shalt.err (!%p1262_p6)
}
 0x22b   :  { %954 = dma.vmem_to_hbm [thread:$0]  %s949_s5, 512, %s1731_s6, [#allocation4], %s1291_s13, %s1291_s13, %s1292_s14  }
 0x22c   :  { %1282 = dma.done.wait [#allocation4], 512  }
 0x22d   :  { %1283 = vsyncadd [#allocation4], 4294966784 }
 0x22e   :  { %958 = vsyncpa [#allocation3], 1 }
 0x22f   :  { %959 = vsyncpa [#allocation6], 1 }
 0x230   :  { %960 = vsyncpa [#allocation9], 1 }
 0x231   :  { %961 = vsyncpa [#allocation12], 1 }
 0x232   :  { %962 = vsyncpa [#allocation4], 1 }

// kernel: tpu_custom_call.1
= control target key start
LH: loop header
LB: loop body
LE: loop exit
PB: predicated region body
PF: predicated region fallthrough
CT: control target
= control target key end

     0   :  { %11 = vsyncpa [#allocation3], 0  ;;  %s1725_s0 = inlined_call_operand.hbm [shape: f32[4,8,128], index: 0, kind: input, shape index: {}]   ;;  %s1726_s1 = inlined_call_operand.hbm [shape: f32[128,256], index: 1, kind: input, shape index: {}]   ;;  %s1727_s2 = inlined_call_operand.hbm [shape: f32[4,4,128], index: 2, kind: input, shape index: {}]   ;;  %s1728_s3 = inlined_call_operand.hbm [shape: f32[4,4,128], index: 3, kind: input, shape index: {}]   ;;  %s1729_s4 = inlined_call_operand.hbm [shape: f32[128,128], index: 4, kind: input, shape index: {}]   ;;  %s1730_s5 = inlined_call_operand.hbm [shape: f32[128,128], index: 5, kind: input, shape index: {}]   ;;  %s1731_s6 = inlined_call_operand.hbm [shape: f32[4,8,128], index: 6, kind: output, shape index: {}]  }
   0x1   :  { %12 = vsyncpa [#allocation6], 0 }
   0x2   :  { %13 = vsyncpa [#allocation9], 0 }
   0x3   :  { %14 = vsyncpa [#allocation12], 0 }
   0x4   :  { %15 = vsyncpa [#allocation4], 0  ;;  %s1284_s21 = smov [#allocation5]  }
   0x5   :  { %s33_s22 = sshll.u32 %s1284_s21, 4  ;;  %s34_s22 = int_to_ptr.vmem [resolvable:$true] %s33_s22 }
   0x6   :  { %s1142_s23 = scalar_lea.vmem %s34_s22, 4096  ;;  %p1147_p1 = scmp.lt.s32.totalorder %s34_s22, %s34_s22 }
   0x7   :  { %p1143_p0 = scmp.ne.s32.totalorder %s34_s22, %s1142_s23  ;;  %p1148_p2 = scmp.lt.s32.totalorder %s1142_s23, %s1142_s23 }
   0x9   :  { %p1149_p3 = por %p1148_p2, %p1147_p1 }
   0xb   :  { %p1150_p4 = pnand %p1149_p3, %p1143_p0 }
   0xd   :  { %1153 = shalt.err (!%p1150_p4)
}
   0xe   :  { %s1285_s24 = smov 256   ;;  %s1286_s25 = smov 16  }
   0xf   :  { %39 = dma.hbm_to_vmem [thread:$0]  %s1726_s1, 4096, %s34_s22, [#allocation6], %s1285_s24, %s1285_s24, %s1286_s25  }
  0x10   :  { %s1287_s28 = smov [#allocation8]   ;;  %s1288_s30 = smov [#allocation2]  }
  0x11   :  { %s57_s29 = sshll.u32 %s1287_s28, 4  ;;  %s21_s7 = sshll.u32 %s1288_s30, 4  ;;  %s58_s29 = int_to_ptr.vmem [resolvable:$true] %s57_s29  ;;  %s22_s7 = int_to_ptr.vmem [resolvable:$true] %s21_s7 }
  0x12   :  { %s1162_s8 = scalar_lea.vmem %s58_s29, 256  ;;  %p1167_p6 = scmp.lt.s32.totalorder %s58_s29, %s58_s29 }
  0x13   :  { %p1163_p5 = scmp.ne.s32.totalorder %s58_s29, %s1162_s8  ;;  %p1168_p7 = scmp.lt.s32.totalorder %s1162_s8, %s1162_s8 }
  0x15   :  { %p1169_p8 = por %p1168_p7, %p1167_p6 }
  0x17   :  { %p1170_p9 = pnand %p1169_p8, %p1163_p5 }
  0x19   :  { %1173 = shalt.err (!%p1170_p9)
}
  0x1a   :  { %s1289_s9 = smov 64   ;;  %s1290_s10 = smov 4  }
  0x1b   :  { %63 = dma.hbm_to_vmem [thread:$0]  %s1728_s3, 256, %s58_s29, [#allocation9], %s1289_s9, %s1289_s9, %s1290_s10  }
  0x1c   :  { %s1182_s1 = scalar_lea.vmem %s22_s7, 512  ;;  %p1187_p11 = scmp.lt.s32.totalorder %s22_s7, %s22_s7 }
  0x1d   :  { %p1183_p10 = scmp.ne.s32.totalorder %s22_s7, %s1182_s1  ;;  %p1188_p12 = scmp.lt.s32.totalorder %s1182_s1, %s1182_s1 }
  0x1f   :  { %p1189_p13 = por %p1188_p12, %p1187_p11 }
  0x21   :  { %p1190_p0 = pnand %p1189_p13, %p1183_p10 }
  0x23   :  { %1193 = shalt.err (!%p1190_p0)
}
  0x24   :  { %s1291_s13 = smov 128   ;;  %s1292_s14 = smov 8  }
  0x25   :  { %27 = dma.hbm_to_vmem [thread:$0]  %s1725_s0, 512, %s22_s7, [#allocation3], %s1291_s13, %s1291_s13, %s1292_s14  }
  0x26   :  { %s1293_s17 = smov [#allocation7]   ;;  %s1294_s3 = smov [#allocation10]  }
  0x27   :  { %s45_s18 = sshll.u32 %s1293_s17, 4  ;;  %s69_s19 = sshll.u32 %s1294_s3, 4  ;;  %s46_s18 = int_to_ptr.vmem [resolvable:$true] %s45_s18  ;;  %s70_s19 = int_to_ptr.vmem [resolvable:$true] %s69_s19 }
  0x28   :  { %s1202_s20 = scalar_lea.vmem %s46_s18, 256  ;;  %p1207_p2 = scmp.lt.s32.totalorder %s46_s18, %s46_s18 }
  0x29   :  { %p1203_p1 = scmp.ne.s32.totalorder %s46_s18, %s1202_s20  ;;  %p1208_p3 = scmp.lt.s32.totalorder %s1202_s20, %s1202_s20 }
  0x2b   :  { %p1209_p4 = por %p1208_p3, %p1207_p2 }
  0x2d   :  { %p1210_p5 = pnand %p1209_p4, %p1203_p1 }
  0x2f   :  { %1213 = shalt.err (!%p1210_p5)
}
  0x30   :  { %51 = dma.hbm_to_vmem [thread:$0]  %s1727_s2, 256, %s46_s18, [#allocation6], %s1289_s9, %s1289_s9, %s1290_s10  }
  0x31   :  { %s1222_s23 = scalar_lea.vmem %s70_s19, 2048  ;;  %p1227_p7 = scmp.lt.s32.totalorder %s70_s19, %s70_s19 }
  0x32   :  { %p1223_p6 = scmp.ne.s32.totalorder %s70_s19, %s1222_s23  ;;  %p1228_p8 = scmp.lt.s32.totalorder %s1222_s23, %s1222_s23 }
  0x34   :  { %p1229_p9 = por %p1228_p8, %p1227_p7 }
  0x36   :  { %p1230_p10 = pnand %p1229_p9, %p1223_p6 }
  0x38   :  { %1233 = shalt.err (!%p1230_p10)
}
  0x39   :  { %75 = dma.hbm_to_vmem [thread:$0]  %s1729_s4, 2048, %s70_s19, [#allocation9], %s1291_s13, %s1291_s13, %s1292_s14  }
  0x3a   :  { %s1295_s25 = smov [#allocation11]  }
  0x3b   :  { %s81_s26 = sshll.u32 %s1295_s25, 4  ;;  %s82_s26 = int_to_ptr.vmem [resolvable:$true] %s81_s26 }
  0x3c   :  { %s1242_s27 = scalar_lea.vmem %s82_s26, 2048  ;;  %p1247_p12 = scmp.lt.s32.totalorder %s82_s26, %s82_s26 }
  0x3d   :  { %p1243_p11 = scmp.ne.s32.totalorder %s82_s26, %s1242_s27  ;;  %p1248_p13 = scmp.lt.s32.totalorder %s1242_s27, %s1242_s27 }
  0x3f   :  { %p1249_p0 = por %p1248_p13, %p1247_p12 }
  0x41   :  { %p1250_p1 = pnand %p1249_p0, %p1243_p11 }
  0x43   :  { %1253 = shalt.err (!%p1250_p1)
}
  0x44   :  { %87 = dma.hbm_to_vmem [thread:$0]  %s1730_s5, 2048, %s82_s26, [#allocation12], %s1291_s13, %s1291_s13, %s1292_s14  }
  0x45   :  { %1274 = dma.done.wait [#allocation3], 512  }
  0x46   :  { %1275 = vsyncadd [#allocation3], 4294966784 }
  0x47   :  { %1276 = dma.done.wait [#allocation6], 4352  }
  0x48   :  { %1277 = vsyncadd [#allocation6], 4294962944 }
  0x49   :  { %1278 = dma.done.wait [#allocation9], 2304  }
  0x4a   :  { %1279 = vsyncadd [#allocation9], 4294964992 }
  0x4b   :  { %1280 = dma.done.wait [#allocation12], 2048  }
  0x4c   :  { %1281 = vsyncadd [#allocation12], 4294965248  ;;  %v1296_v0 = vmov 0.0   ;;  %v141_v1 = vld [vmem:[#allocation5 + $0xf8] sm:$0xff]  ;;  %v140_v2 = vld [vmem:[#allocation5 + $0xf0] sm:$0xff]  ;;  %s1298_s4 = smov [#allocation13]  }
  0x4d   :  { %206 = vmatprep.mubr.f32.mxu0 %v1296_v0  ;;  %v139_v3 = vld [vmem:[#allocation5 + $0xe8] sm:$0xff]  ;;  %142 = vmatprep.subr.mxu0 %v141_v1  ;;  %v138_v4 = vld [vmem:[#allocation5 + $0xe0] sm:$0xff]  ;;  %v137_v5 = vld [vmem:[#allocation5 + $0xd8] sm:$0xff]  ;;  %s948_s5 = sshll.u32 %s1298_s4, 4  ;;  %s949_s5 = int_to_ptr.vmem [resolvable:$true] %s948_s5 }
  0x4e   :  { %143 = vmatpush1.msra.mxu0 %v140_v2  ;;  %v136_v6 = vld [vmem:[#allocation5 + $0xd0] sm:$0xff]  ;;  %v135_v7 = vld [vmem:[#allocation5 + $0xc8] sm:$0xff]  ;;  %v134_v8 = vld [vmem:[#allocation5 + $0xc0] sm:$0xff]  ;;  %s1254_s29 = scalar_lea.vmem %s949_s5, 512  ;;  %p1259_p3 = scmp.lt.s32.totalorder %s949_s5, %s949_s5 }
  0x4f   :  { %144 = vmatprep.subr.mxu0 %v139_v3  ;;  %v133_v9 = vld [vmem:[#allocation5 + $0xb8] sm:$0xff]  ;;  %v132_v10 = vld [vmem:[#allocation5 + $0xb0] sm:$0xff]  ;;  %v131_v11 = vld [vmem:[#allocation5 + $0xa8] sm:$0xff]  ;;  %p1255_p2 = scmp.ne.s32.totalorder %s949_s5, %s1254_s29  ;;  %p1260_p4 = scmp.lt.s32.totalorder %s1254_s29, %s1254_s29 }
  0x50   :  { %145 = vmatpush1.msra.mxu0 %v138_v4  ;;  %v130_v12 = vld [vmem:[#allocation5 + $0xa0] sm:$0xff]  ;;  %v129_v13 = vld [vmem:[#allocation5 + $0x98] sm:$0xff]  ;;  %v128_v14 = vld [vmem:[#allocation5 + $0x90] sm:$0xff] }
  0x51   :  { %146 = vmatprep.subr.mxu0 %v137_v5  ;;  %v127_v15 = vld [vmem:[#allocation5 + $0x88] sm:$0xff]  ;;  %v748_v16 = vld [vmem:[#allocation10 + $0x78] sm:$0xff]  ;;  %v747_v17 = vld [vmem:[#allocation10 + $0x70] sm:$0xff]  ;;  %v1297_v5 = vmov 1966171168   ;;  %p1261_p5 = por %p1260_p4, %p1259_p3 }
  0x52   :  { %147 = vmatpush1.msra.mxu0 %v136_v6  ;;  %v126_v18 = vld [vmem:[#allocation5 + $0x80] sm:$0xff]  ;;  %1011 = vmatprep.subr.mxu1 %v748_v16  ;;  %v125_v19 = vld [vmem:[#allocation5 + $0x78] sm:$0xff]  ;;  %v746_v20 = vld [vmem:[#allocation10 + $0x68] sm:$0xff]  ;;  %v242_v6 = vunpack.c.l.s4 %v1297_v5 }
  0x53   :  { %148 = vmatprep.subr.mxu0 %v135_v7  ;;  %1012 = vmatpush3.msra.mxu1 %v748_v16  ;;  %v124_v21 = vld [vmem:[#allocation5 + $0x70] sm:$0xff]  ;;  %v123_v22 = vld [vmem:[#allocation5 + $0x68] sm:$0xff]  ;;  %v745_v23 = vld [vmem:[#allocation10 + $0x60] sm:$0xff]  ;;  %v244_v7 = vlaneseq  ;;  %p1262_p6 = pnand %p1261_p5, %p1255_p2 }
  0x54   :  { %149 = vmatpush1.msra.mxu0 %v134_v8  ;;  %1013 = vmatprep.subr.mxu1 %v747_v17  ;;  %v122_v24 = vld [vmem:[#allocation5 + $0x60] sm:$0xff]  ;;  %v121_v25 = vld [vmem:[#allocation5 + $0x58] sm:$0xff]  ;;  %v120_v27 = vld [vmem:[#allocation5 + $0x50] sm:$0xff]  ;;  %v243_v8 = vunpack.c.0.s8 %v242_v6 }
  0x55   :  { %150 = vmatprep.subr.mxu0 %v133_v9  ;;  %1014 = vmatpush3.msra.mxu1 %v747_v17  ;;  %v744_v26 = vld [vmem:[#allocation10 + $0x58] sm:$0xff]  ;;  %v119_v28 = vld [vmem:[#allocation5 + $0x48] sm:$0xff]  ;;  %v743_v29 = vld [vmem:[#allocation10 + $0x50] sm:$0xff]  ;;  %v245_v9 = vshrl.u32 %v244_v7, 7 }
  0x56   :  { %151 = vmatpush1.msra.mxu0 %v132_v10  ;;  %1015 = vmatprep.subr.mxu1 %v746_v20  ;;  %v118_v30 = vld [vmem:[#allocation5 + $0x40] sm:$0xff]  ;;  %v117_v31 = vld [vmem:[#allocation5 + $0x38] sm:$0xff]  ;;  %v116_v32 = vld [vmem:[#allocation5 + $0x30] sm:$0xff] }
  0x57   :  { %152 = vmatprep.subr.mxu0 %v131_v11  ;;  %1016 = vmatpush3.msra.mxu1 %v746_v20  ;;  %v115_v33 = vld [vmem:[#allocation5 + $0x28] sm:$0xff]  ;;  %v114_v34 = vld [vmem:[#allocation5 + $0x20] sm:$0xff]  ;;  %v113_v35 = vld [vmem:[#allocation5 + $0x18] sm:$0xff]  ;;  %v246_v11 = vsub.s32 %v243_v8, %v245_v9 }
  0x58   :  { %153 = vmatpush1.msra.mxu0 %v130_v12  ;;  %1017 = vmatprep.subr.mxu1 %v745_v23  ;;  %v112_v36 = vld [vmem:[#allocation5 + $0x10] sm:$0xff]  ;;  %v111_v37 = vld [vmem:[#allocation5 + $0x8] sm:$0xff]  ;;  %v110_v38 = vld [vmem:[#allocation5] sm:$0xff] }
  0x59   :  { %154 = vmatprep.subr.mxu0 %v129_v13  ;;  %1018 = vmatpush3.msra.mxu1 %v745_v23  ;;  %v106_v39 = vld [vmem:[#allocation2] sm:$0xff]  ;;  %v1362_v40 = vld [vmem:[#allocation11 + $0x78] sm:$0xff]  ;;  %v1364_v41 = vld [vmem:[#allocation11 + $0x70] sm:$0xff] }
  0x5a   :  { %155 = vmatpush1.msra.mxu0 %v128_v14  ;;  %1019 = vmatprep.subr.mxu1 %v744_v26  ;;  %v107_v42 = vld [vmem:[#allocation2 + $0x8] sm:$0xff]  ;;  %v1373_v44 = vld [vmem:[#allocation11 + $0x60] sm:$0xff]  ;;  %v108_v45 = vld [vmem:[#allocation2 + $0x10] sm:$0xff] }
  0x5b   :  { %156 = vmatprep.subr.mxu0 %v127_v15  ;;  %1020 = vmatpush3.msra.mxu1 %v744_v26  ;;  %v1369_v43 = vld [vmem:[#allocation11 + $0x68] sm:$0xff]  ;;  %v1378_v46 = vld [vmem:[#allocation11 + $0x58] sm:$0xff]  ;;  %v1385_v48 = vld [vmem:[#allocation11 + $0x50] sm:$0xff] }
  0x5c   :  { %157 = vmatpush1.msra.mxu0 %v126_v18  ;;  %1021 = vmatprep.subr.mxu1 %v743_v29  ;;  %v109_v47 = vld [vmem:[#allocation2 + $0x18] sm:$0xff]  ;;  %v742_v49 = vld [vmem:[#allocation10 + $0x48] sm:$0xff]  ;;  %v741_v51 = vld [vmem:[#allocation10 + $0x40] sm:$0xff] }
  0x5d   :  { %158 = vmatprep.subr.mxu0 %v125_v19  ;;  %1022 = vmatpush3.msra.mxu1 %v743_v29  ;;  %v1389_v50 = vld [vmem:[#allocation11 + $0x48] sm:$0xff]  ;;  %v1393_v52 = vld [vmem:[#allocation11 + $0x40] sm:$0xff]  ;;  %v740_v53 = vld [vmem:[#allocation10 + $0x38] sm:$0xff]  ;;  %v1430_v19 = vsub.s32 0, %v245_v9 }
  0x5e   :  { %159 = vmatpush1.msra.mxu0 %v124_v21  ;;  %1023 = vmatprep.subr.mxu1 %v742_v49  ;;  %1752 = vst [vmem:[#allocation19_spill] sm:$0xff] %v1393_v52  ;;  %v1397_v54 = vld [vmem:[#allocation11 + $0x38] sm:$0xff]  ;;  %v739_v55 = vld [vmem:[#allocation10 + $0x30] sm:$0xff]  ;;  %v738_v57 = vld [vmem:[#allocation10 + $0x28] sm:$0xff] }
  0x5f   :  { %160 = vmatprep.subr.mxu0 %v123_v22  ;;  %1024 = vmatpush3.msra.mxu1 %v742_v49  ;;  %1753 = vst [vmem:[#allocation20_spill] sm:$0xff] %v1397_v54  ;;  %v1401_v56 = vld [vmem:[#allocation11 + $0x30] sm:$0xff]  ;;  %v1405_v58 = vld [vmem:[#allocation11 + $0x28] sm:$0xff]  ;;  %v737_v59 = vld [vmem:[#allocation10 + $0x20] sm:$0xff] }
  0x60   :  { %161 = vmatpush1.msra.mxu0 %v122_v24  ;;  %1025 = vmatprep.subr.mxu1 %v741_v51  ;;  %1754 = vst [vmem:[#allocation21_spill] sm:$0xff] %v1401_v56  ;;  %1755 = vst [vmem:[#allocation22_spill] sm:$0xff] %v1405_v58  ;;  %v1409_v60 = vld [vmem:[#allocation11 + $0x20] sm:$0xff]  ;;  %v736_v61 = vld [vmem:[#allocation10 + $0x18] sm:$0xff] }
  0x61   :  { %162 = vmatprep.subr.mxu0 %v121_v25  ;;  %1026 = vmatpush3.msra.mxu1 %v741_v51  ;;  %1756 = vst [vmem:[#allocation23_spill] sm:$0xff] %v1409_v60  ;;  %v1413_v62 = vld [vmem:[#allocation11 + $0x18] sm:$0xff]  ;;  %v735_v63 = vld [vmem:[#allocation10 + $0x10] sm:$0xff]  ;;  %v734_v1 = vld [vmem:[#allocation10 + $0x8] sm:$0xff] }
  0x62   :  { %163 = vmatpush1.msra.mxu0 %v120_v27  ;;  %1027 = vmatprep.subr.mxu1 %v740_v53  ;;  %1757 = vst [vmem:[#allocation24_spill] sm:$0xff] %v1413_v62  ;;  %v1419_v2 = vld [vmem:[#allocation11 + $0x8] sm:$0xff]  ;;  %v733_v3 = vld [vmem:[#allocation10] sm:$0xff] }
  0x63   :  { %164 = vmatprep.subr.mxu0 %v119_v28  ;;  %1028 = vmatpush3.msra.mxu1 %v740_v53  ;;  %1759 = vst [vmem:[#allocation26_spill] sm:$0xff] %v1419_v2  ;;  %v1423_v4 = vld [vmem:[#allocation11] sm:$0xff]  ;;  %v964_v12 = vld.sshfl [vmem:[#allocation8] sm:$0x33 pattern:$0x75316420] }
  0x64   :  { %165 = vmatpush1.msra.mxu0 %v118_v30  ;;  %1029 = vmatprep.subr.mxu1 %v739_v55  ;;  %1760 = vst [vmem:[#allocation27_spill] sm:$0xff] %v1423_v4  ;;  %v963_v10 = vld.sshfl [vmem:[#allocation7] sm:$0x33 pattern:$0x75316420]  ;;  %v266_v15 = vcombine.high %v964_v12, %v964_v12  ;;  %v273_v18 = vrot.slane %v964_v12, %v246_v11 }
  0x65   :  { %166 = vmatprep.subr.mxu0 %v117_v31  ;;  %1030 = vmatpush3.msra.mxu1 %v739_v55  ;;  %v965_v13 = vld.sshfl [vmem:[#allocation7 + $0x4] sm:$0x33 pattern:$0x75316420]  ;;  %v240_v14 = vcombine.high %v963_v10, %v963_v10  ;;  %v247_v17 = vrot.slane %v963_v10, %v246_v11 }
  0x66   :  { %167 = vmatpush1.msra.mxu0 %v116_v32  ;;  %1031 = vmatprep.subr.mxu1 %v738_v57  ;;  %v966_v16 = vld.sshfl [vmem:[#allocation8 + $0x4] sm:$0x33 pattern:$0x75316420]  ;;  %v365_v20 = vcombine.high %v965_v13, %v965_v13  ;;  %v372_v23 = vrot.slane %v965_v13, %v246_v11  ;;  %v280_v27 = vrot.slane %v266_v15, %v246_v11 }
  0x67   :  { %168 = vmatprep.subr.mxu0 %v115_v33  ;;  %1032 = vmatpush3.msra.mxu1 %v738_v57  ;;  %v392_v21 = vcombine.high %v966_v16, %v966_v16  ;;  %v967_v22 = vld.sshfl [vmem:[#allocation7 + $0x8] sm:$0x33 pattern:$0x75316420]  ;;  %v399_v24 = vrot.slane %v966_v16, %v246_v11  ;;  %v254_v26 = vrot.slane %v240_v14, %v246_v11 }
  0x68   :  { %169 = vmatpush1.msra.mxu0 %v114_v34  ;;  %1033 = vmatprep.subr.mxu1 %v737_v59  ;;  %v968_v25 = vld.sshfl [vmem:[#allocation8 + $0x8] sm:$0x33 pattern:$0x75316420]  ;;  %v255_v28 = vcombine.high %v247_v17, %v247_v17  ;;  %v281_v29 = vcombine.high %v273_v18, %v273_v18  ;;  %v1433_v30 = vrot.slane %v247_v17, %v1430_v19 }
  0x69   :  { %170 = vmatprep.subr.mxu0 %v113_v35  ;;  %1034 = vmatpush3.msra.mxu1 %v737_v59  ;;  %v969_v31 = vld.sshfl [vmem:[#allocation7 + $0xc] sm:$0x33 pattern:$0x75316420]  ;;  %v1436_v32 = vrot.slane %v273_v18, %v1430_v19  ;;  %v1439_v33 = vrot.slane %v254_v26, %v1430_v19  ;;  %v1442_v34 = vrot.slane %v280_v27, %v1430_v19 }
  0x6a   :  { %171 = vmatpush1.msra.mxu0 %v112_v36  ;;  %1035 = vmatprep.subr.mxu1 %v736_v61  ;;  %v379_v35 = vrot.slane %v365_v20, %v246_v11  ;;  %v491_v36 = vcombine.high %v967_v22, %v967_v22  ;;  %v525_v49 = vrot.slane %v968_v25, %v246_v11 }
  0x6b   :  { %172 = vmatprep.subr.mxu0 %v111_v37  ;;  %1036 = vmatpush3.msra.mxu1 %v736_v61  ;;  %v498_v37 = vrot.slane %v967_v22, %v246_v11  ;;  %v617_v51 = vcombine.high %v969_v31, %v969_v31  ;;  %v1445_v53 = vrot.slane %v372_v23, %v1430_v19 }
  0x6c   :  { %173 = vmatpush1.msra.mxu0 %v110_v38  ;;  %1037 = vmatprep.subr.mxu1 %v735_v63  ;;  %v518_v38 = vcombine.high %v968_v25, %v968_v25  ;;  %v1448_v55 = vrot.slane %v399_v24, %v1430_v19  ;;  %v1451_v57 = vrot.slane %v255_v28, %v1430_v19 }
  0x6d   :  { %207 = vmatmul.mubr.f32.vlgmr.msra.gmra.mxu0 %v106_v39  ;;  %1049 = vmatprep.subr.mxu0 %v1362_v40  ;;  %v970_v39 = vld.sshfl [vmem:[#allocation8 + $0xc] sm:$0x33 pattern:$0x75316420]  ;;  %v1454_v59 = vrot.slane %v281_v29, %v1430_v19  ;;  %v624_v61 = vrot.slane %v969_v31, %v246_v11  ;;  %v506_v5 = vcombine.high %v498_v37, %v498_v37 }
  0x6e   :  { %212 = vmatprep.mubr.f32.mxu0 %v1296_v0  ;;  %1050 = vmatpush3.msra.mxu0 %v1362_v40  ;;  %v651_v6 = vrot.slane %v970_v39, %v246_v11  ;;  %v505_v7 = vrot.slane %v491_v36, %v246_v11  ;;  %v532_v8 = vrot.slane %v518_v38, %v246_v11 }
  0x6f   :  { %1051 = vmatprep.subr.mxu0 %v1364_v41  ;;  %1038 = vmatpush3.msra.mxu1 %v735_v63  ;;  %v644_v63 = vcombine.high %v970_v39, %v970_v39  ;;  %v533_v9 = vcombine.high %v525_v49, %v525_v49  ;;  %v1463_v10 = vrot.slane %v498_v37, %v1430_v19 }
  0x70   :  { %1052 = vmatpush3.msra.mxu0 %v1364_v41  ;;  %1039 = vmatprep.subr.mxu1 %v734_v1  ;;  %v1466_v12 = vrot.slane %v525_v49, %v1430_v19  ;;  %v631_v13 = vrot.slane %v617_v51, %v246_v11  ;;  %v1469_v14 = vrot.slane %v505_v7, %v1430_v19 }
  0x71   :  { %213 = vmatmul.mubr.f32.gmra.mxu0 %v107_v42  ;;  %1053 = vmatprep.subr.mxu0 %v1369_v43  ;;  %v406_v42 = vrot.slane %v392_v21, %v246_v11  ;;  %v1472_v15 = vrot.slane %v532_v8, %v1430_v19  ;;  %v256_v16 = vcombine.high %v254_v26, %v254_v26 }
  0x72   :  { %218 = vmatprep.mubr.f32.mxu0 %v1296_v0  ;;  %1054 = vmatpush3.msra.mxu0 %v1369_v43  ;;  %v282_v17 = vcombine.high %v280_v27, %v280_v27  ;;  %v632_v18 = vcombine.high %v624_v61, %v624_v61  ;;  %v1474_v20 = vrot.slane %v644_v63, %v246_v11 }
  0x73   :  { %1055 = vmatprep.subr.mxu0 %v1373_v44  ;;  %1040 = vmatpush3.msra.mxu1 %v734_v1  ;;  %v1457_v1 = vrot.slane %v379_v35, %v1430_v19  ;;  %v381_v21 = vcombine.high %v379_v35, %v379_v35  ;;  %v408_v22 = vcombine.high %v406_v42, %v406_v42 }
  0x74   :  { %1056 = vmatpush3.msra.mxu0 %v1373_v44  ;;  %1041 = vmatprep.subr.mxu1 %v733_v3  ;;  %v507_v25 = vcombine.high %v505_v7, %v505_v7  ;;  %v534_v28 = vcombine.high %v532_v8, %v532_v8  ;;  %v1480_v29 = vrot.slane %v624_v61, %v1430_v19 }
  0x75   :  { %219 = vmatmul.mubr.f32.gmra.mxu0 %v108_v45  ;;  %1057 = vmatprep.subr.mxu0 %v1378_v46  ;;  %v380_v45 = vcombine.high %v372_v23, %v372_v23  ;;  %v659_v23 = vcombine.high %v651_v6, %v651_v6  ;;  %v1483_v31 = vrot.slane %v651_v6, %v1430_v19 }
  0x76   :  { %224 = vmatprep.mubr.f32.mxu0 %v1296_v0  ;;  %1058 = vmatpush3.msra.mxu0 %v1378_v46  ;;  %v1416_v0 = vld [vmem:[#allocation11 + $0x10] sm:$0xff]  ;;  %v633_v27 = vcombine.high %v631_v13, %v631_v13  ;;  %v1489_v11 = vrot.slane %v631_v13, %v1430_v19  ;;  %v1493_v35 = vrot.slane %v1474_v20, %v1430_v19 }
  0x77   :  { %1059 = vmatprep.subr.mxu0 %v1385_v48  ;;  %1758 = vst [vmem:[#allocation25_spill] sm:$0xff] %v1416_v0  ;;  %1042 = vmatpush3.msra.mxu1 %v733_v3  ;;  %v1460_v3 = vrot.slane %v406_v42, %v1430_v19  ;;  %v1496_v36 = vrot.slane %v256_v16, %v1430_v19 }
  0x78   :  { %1060 = vmatpush3.msra.mxu0 %v1385_v48  ;;  %1087 = vmatprep.subr.mxu1 %v1362_v40  ;;  %v1499_v37 = vrot.slane %v282_v17, %v1430_v19  ;;  %v1504_v39 = vrot.slane %v506_v5, %v1430_v19  ;;  %v1507_v42 = vrot.slane %v533_v9, %v1430_v19 }
  0x79   :  { %225 = vmatmul.mubr.f32.gmra.mxu0 %v109_v47  ;;  %1061 = vmatprep.subr.mxu0 %v1389_v50  ;;  %v407_v47 = vcombine.high %v399_v24, %v399_v24  ;;  %v1477_v24 = vrot.slane %v380_v45, %v1430_v19  ;;  %1761 = vst [vmem:[#allocation28_spill] sm:$0xff] %v1496_v36 }
  0x7a   :  { %1062 = vmatpush3.msra.mxu0 %v1389_v50  ;;  %1762 = vst [vmem:[#allocation29_spill] sm:$0xff] %v1499_v37  ;;  %v1510_v45 = vrot.slane %v381_v21, %v1430_v19  ;;  %v1516_v49 = vrot.slane %v632_v18, %v1430_v19  ;;  %v1519_v51 = vrot.slane %v659_v23, %v1430_v19 }
  0x7b   :  { %1063 = vmatprep.subr.mxu0 %v1393_v52  ;;  %v1486_v26 = vrot.slane %v407_v47, %v1430_v19  ;;  %v1513_v47 = vrot.slane %v408_v22, %v1430_v19  ;;  %v1522_v61 = vrot.slane %v507_v25, %v1430_v19  ;;  %v1525_v63 = vrot.slane %v534_v28, %v1430_v19 }
  0x7c   :  { %1064 = vmatpush3.msra.mxu0 %v1393_v52  ;;  %v1536_v9 = vrot.slane %v633_v27, %v1430_v19 }
  0x7d   :  { %1065 = vmatprep.subr.mxu0 %v1397_v54 }
  0x7e   :  { %1066 = vmatpush3.msra.mxu0 %v1397_v54 }
  0x7f   :  { %1067 = vmatprep.subr.mxu0 %v1401_v56 }
  0x80   :  { %1068 = vmatpush3.msra.mxu0 %v1401_v56 }
  0x81   :  { %1069 = vmatprep.subr.mxu0 %v1405_v58 }
  0x82   :  { %1070 = vmatpush3.msra.mxu0 %v1405_v58 }
  0x83   :  { %1071 = vmatprep.subr.mxu0 %v1409_v60 }
  0x84   :  { %1072 = vmatpush3.msra.mxu0 %v1409_v60 }
  0x85   :  { %1073 = vmatprep.subr.mxu0 %v1413_v62 }
  0x86   :  { %1074 = vmatpush3.msra.mxu0 %v1413_v62 }
  0x87   :  { %1075 = vmatprep.subr.mxu0 %v1416_v0 }
  0x88   :  { %1076 = vmatpush3.msra.mxu0 %v1416_v0 }
  0x89   :  { %1077 = vmatprep.subr.mxu0 %v1419_v2 }
  0x8a   :  { %1078 = vmatpush3.msra.mxu0 %v1419_v2 }
  0x8b   :  { %1079 = vmatprep.subr.mxu0 %v1423_v4 }
  0x8c   :  { %1080 = vmatpush3.msra.mxu0 %v1423_v4 }
 0x12d   :  { %v1501_v38 = vpop.f32.mrf.mxu0 }
 0x12e   :  { %v303_v6 = vmul.f32 %v1433_v30, %v1501_v38  ;;  %v339_v7 = vmul.f32 %v1436_v32, %v1501_v38  ;;  %v304_v17 = vmul.f32 %v1439_v33, %v1501_v38  ;;  %v340_v22 = vmul.f32 %v1442_v34, %v1501_v38 }
 0x12f   :  { %v1527_v5 = vpop.f32.mrf.mxu0  ;;  %v1564_v27 = vmul.f32 %v1496_v36, %v1501_v38 }
 0x130   :  { %v327_v13 = vmul.f32 %v1436_v32, %v1527_v5  ;;  %v343_v16 = vmul.f32 %v1433_v30, %v1527_v5  ;;  %v328_v18 = vmul.f32 %v1442_v34, %v1527_v5  ;;  %v344_v23 = vmul.f32 %v1439_v33, %v1527_v5 }
 0x131   :  { %v1546_v21 = vpop.f32.mrf.mxu0  ;;  %v1554_v32 = vmul.f32 %v1451_v57, %v1501_v38  ;;  %v1558_v30 = vmul.f32 %v1454_v59, %v1527_v5  ;;  %v1568_v34 = vmul.f32 %v1499_v37, %v1527_v5 }
 0x132   :  { %v331_v25 = vsub.f32 %v303_v6, %v327_v13  ;;  %v429_v28 = vmul.f32 %v1445_v53, %v1546_v21  ;;  %v347_v8 = vadd.f32 %v343_v16, %v339_v7  ;;  %v465_v4 = vmul.f32 %v1448_v55, %v1546_v21 }
 0x133   :  { %v1570_v33 = vpop.f32.mrf.mxu0  ;;  %v332_v2 = vsub.f32 %v304_v17, %v328_v18  ;;  %v430_v6 = vmul.f32 %v1457_v1, %v1546_v21  ;;  %v466_v16 = vmul.f32 %v1460_v3, %v1546_v21  ;;  %v348_v17 = vadd.f32 %v344_v23, %v340_v22 }
 0x134   :  { %v453_v13 = vmul.f32 %v1448_v55, %v1570_v33  ;;  %v469_v0 = vmul.f32 %v1445_v53, %v1570_v33  ;;  %v454_v62 = vmul.f32 %v1460_v3, %v1570_v33  ;;  %v470_v60 = vmul.f32 %v1457_v1, %v1570_v33 }
 0x135   :  { %v1584_v7 = vpop.f32.mrf.mxu0  ;;  %v333_v18 = vsub.f32 %v1554_v32, %v1558_v30  ;;  %v431_v55 = vmul.f32 %v1477_v24, %v1546_v21  ;;  %v455_v1 = vmul.f32 %v1486_v26, %v1570_v33 }
 0x136   :  { %v457_v37 = vsub.f32 %v429_v28, %v453_v13  ;;  %v555_v53 = vmul.f32 %v1463_v10, %v1584_v7  ;;  %v473_v58 = vadd.f32 %v469_v0, %v465_v4  ;;  %v591_v3 = vmul.f32 %v1466_v12, %v1584_v7 }
 0x137   :  { %v1596_v36 = vpop.f32.mrf.mxu0  ;;  %v458_v22 = vsub.f32 %v430_v6, %v454_v62  ;;  %v556_v23 = vmul.f32 %v1469_v14, %v1584_v7  ;;  %v474_v32 = vadd.f32 %v470_v60, %v466_v16  ;;  %v592_v4 = vmul.f32 %v1472_v15, %v1584_v7 }
 0x138   :  { %v461_v30 = vadd.f32 %v457_v37, %v331_v25  ;;  %v579_v28 = vmul.f32 %v1466_v12, %v1596_v36  ;;  %v595_v0 = vmul.f32 %v1463_v10, %v1596_v36  ;;  %v477_v56 = vadd.f32 %v473_v58, %v347_v8 }
 0x139   :  { %v1608_v13 = vpop.f32.mrf.mxu0  ;;  %v462_v54 = vadd.f32 %v458_v22, %v332_v2  ;;  %v580_v62 = vmul.f32 %v1472_v15, %v1596_v36  ;;  %v596_v60 = vmul.f32 %v1469_v14, %v1596_v36  ;;  %v478_v6 = vadd.f32 %v474_v32, %v348_v17 }
 0x13a   :  { %v583_v37 = vsub.f32 %v555_v53, %v579_v28  ;;  %v681_v12 = vmul.f32 %v1480_v29, %v1608_v13  ;;  %v599_v25 = vadd.f32 %v595_v0, %v591_v3  ;;  %v717_v16 = vmul.f32 %v1483_v31, %v1608_v13 }
 0x13b   :  { %v1616_v10 = vpop.f32.mrf.mxu0  ;;  %v584_v52 = vsub.f32 %v556_v23, %v580_v62  ;;  %v682_v58 = vmul.f32 %v1489_v11, %v1608_v13  ;;  %v600_v2 = vadd.f32 %v596_v60, %v592_v4  ;;  %v718_v17 = vmul.f32 %v1493_v35, %v1608_v13 }
 0x13c   :  { %v587_v15 = vadd.f32 %v583_v37, %v461_v30  ;;  %v705_v14 = vmul.f32 %v1483_v31, %v1616_v10  ;;  %v721_v8 = vmul.f32 %v1480_v29, %v1616_v10  ;;  %v603_v53 = vadd.f32 %v599_v25, %v477_v56 }
 0x13d   :  { %v588_v3 = vadd.f32 %v584_v52, %v462_v54  ;;  %v706_v22 = vmul.f32 %v1493_v35, %v1616_v10  ;;  %v722_v23 = vmul.f32 %v1489_v11, %v1616_v10  ;;  %v604_v30 = vadd.f32 %v600_v2, %v478_v6 }
 0x13e   :  { %v709_v32 = vsub.f32 %v681_v12, %v705_v14  ;;  %v725_v28 = vadd.f32 %v721_v8, %v717_v16  ;;  %v459_v0 = vsub.f32 %v431_v55, %v455_v1  ;;  %v557_v29 = vmul.f32 %v1504_v39, %v1584_v7 }
 0x13f   :  { %v710_v4 = vsub.f32 %v682_v58, %v706_v22  ;;  %v726_v31 = vadd.f32 %v722_v23, %v718_v17  ;;  %v581_v62 = vmul.f32 %v1507_v42, %v1596_v36  ;;  %v683_v54 = vmul.f32 %v1516_v49, %v1608_v13 }
 0x140   :  { %v713_v56 = vadd.f32 %v709_v32, %v587_v15  ;;  %v729_v52 = vadd.f32 %v725_v28, %v603_v53  ;;  %v707_v11 = vmul.f32 %v1519_v51, %v1616_v10  ;;  %v463_v37 = vadd.f32 %v459_v0, %v333_v18 }
 0x141   :  { %v714_v35 = vadd.f32 %v710_v4, %v588_v3  ;;  %v730_v60 = vadd.f32 %v726_v31, %v604_v30  ;;  %v585_v55 = vsub.f32 %v557_v29, %v581_v62  ;;  %v432_v12 = vmul.f32 %v1510_v45, %v1546_v21  ;;  %v1768_v29 = vld [vmem:[#allocation22_spill] sm:$0xff]  ;;  %v1769_v62 = vld [vmem:[#allocation29_spill] sm:$0xff] }
 0x142   :  { %1043 = vmatprep.mubr.f32.mxu1 %v713_v56  ;;  %1081 = vmatprep.mubr.f32.mxu0 %v729_v52  ;;  %v711_v1 = vsub.f32 %v683_v54, %v707_v11  ;;  %v456_v25 = vmul.f32 %v1513_v47, %v1570_v33  ;;  %v1763_v16 = vcombine.high %v1474_v20, %v1474_v20 }
 0x143   :  { %1044 = vmatmul.mubr.f32.vlgmr.msra.gmra.mxu1 %v714_v35  ;;  %1082 = vmatmul.mubr.f32.vlgmr.msra.gmra.mxu0 %v730_v60  ;;  %v589_v6 = vadd.f32 %v585_v55, %v463_v37  ;;  %v334_v18 = vsub.f32 %v1564_v27, %v1568_v34  ;;  %v558_v15 = vmul.f32 %v1522_v61, %v1584_v7 }
 0x144   :  { %v700_v58 = vrot.slane %v1763_v16, %v1430_v19  ;;  %1103 = vmatpush3.msra.mxu1 %v1362_v40  ;;  %v460_v2 = vsub.f32 %v432_v12, %v456_v25  ;;  %v582_v14 = vmul.f32 %v1525_v63, %v1596_v36  ;;  %v684_v17 = vmul.f32 %v1536_v9, %v1608_v13 }
 0x145   :  { %v715_v8 = vadd.f32 %v711_v1, %v589_v6  ;;  %1088 = vmatprep.subr.mxu1 %v1364_v41  ;;  %v345_v40 = vmul.f32 %v1451_v57, %v1527_v5  ;;  %v341_v34 = vmul.f32 %v1454_v59, %v1501_v38  ;;  %v467_v3 = vmul.f32 %v1486_v26, %v1546_v21 }
 0x146   :  { %v708_v19 = vmul.f32 %v700_v58, %v1616_v10  ;;  %1104 = vmatpush3.msra.mxu1 %v1364_v41  ;;  %v464_v20 = vadd.f32 %v460_v2, %v334_v18  ;;  %v586_v27 = vsub.f32 %v558_v15, %v582_v14  ;;  %v471_v22 = vmul.f32 %v1477_v24, %v1570_v33 }
 0x147   :  { %1046 = vmatprep.mubr.f32.mxu1 %v715_v8  ;;  %1089 = vmatprep.subr.mxu1 %v1369_v43  ;;  %v593_v41 = vmul.f32 %v1507_v42, %v1584_v7  ;;  %v597_v57 = vmul.f32 %v1504_v39, %v1596_v36  ;;  %v349_v59 = vadd.f32 %v345_v40, %v341_v34 }
 0x148   :  { %v712_v53 = vsub.f32 %v684_v17, %v708_v19  ;;  %v590_v23 = vadd.f32 %v586_v27, %v464_v20  ;;  %1105 = vmatpush3.msra.mxu1 %v1369_v43  ;;  %v475_v32 = vadd.f32 %v471_v22, %v467_v3  ;;  %v719_v28 = vmul.f32 %v1519_v51, %v1608_v13  ;;  %v1766_v51 = vld [vmem:[#allocation21_spill] sm:$0xff] }
 0x149   :  { %1090 = vmatprep.subr.mxu1 %v1373_v44  ;;  %v723_v26 = vmul.f32 %v1516_v49, %v1616_v10  ;;  %v601_v30 = vadd.f32 %v597_v57, %v593_v41  ;;  %v1764_v49 = vld [vmem:[#allocation19_spill] sm:$0xff]  ;;  %v598_v31 = vmul.f32 %v1522_v61, %v1596_v36  ;;  %v724_v56 = vmul.f32 %v1536_v9, %v1616_v10  ;;  %v1773_v9 = vld [vmem:[#allocation26_spill] sm:$0xff] }
 0x14a   :  { %v716_v24 = vadd.f32 %v712_v53, %v590_v23  ;;  %1106 = vmatpush3.msra.mxu1 %v1373_v44  ;;  %v479_v43 = vadd.f32 %v475_v32, %v349_v59  ;;  %v1765_v44 = vld [vmem:[#allocation20_spill] sm:$0xff]  ;;  %v720_v36 = vmul.f32 %v700_v58, %v1608_v13  ;;  %v1774_v10 = vld [vmem:[#allocation27_spill] sm:$0xff] }
 0x14b   :  { %v727_v0 = vadd.f32 %v723_v26, %v719_v28  ;;  %1091 = vmatprep.subr.mxu1 %v1378_v46 }
 0x14c   :  { %1047 = vmatmul.mubr.f32.gmra.mxu1 %v716_v24  ;;  %v605_v39 = vadd.f32 %v601_v30, %v479_v43 }
 0x14d   :  { %1107 = vmatpush3.msra.mxu1 %v1378_v46  ;;  %v472_v46 = vmul.f32 %v1510_v45, %v1570_v33  ;;  %v342_v45 = vmul.f32 %v1769_v62, %v1501_v38  ;;  %v594_v33 = vmul.f32 %v1525_v63, %v1584_v7  ;;  %v1772_v38 = vld [vmem:[#allocation25_spill] sm:$0xff]  ;;  %v728_v63 = vadd.f32 %v724_v56, %v720_v36 }
 0x14e   :  { %1092 = vmatprep.subr.mxu1 %v1385_v48  ;;  %v731_v42 = vadd.f32 %v727_v0, %v605_v39 }
 0x14f   :  { %1108 = vmatpush3.msra.mxu1 %v1385_v48  ;;  %v1767_v48 = vld [vmem:[#allocation28_spill] sm:$0xff] }
 0x150   :  { %1093 = vmatprep.subr.mxu1 %v1389_v50  ;;  %1084 = vmatprep.mubr.f32.mxu1 %v731_v42  ;;  %v346_v4 = vmul.f32 %v1767_v48, %v1527_v5  ;;  %v1770_v5 = vld [vmem:[#allocation23_spill] sm:$0xff] }
 0x151   :  { %1109 = vmatpush3.msra.mxu1 %v1389_v50  ;;  %v468_v50 = vmul.f32 %v1513_v47, %v1546_v21  ;;  %v1771_v47 = vld [vmem:[#allocation24_spill] sm:$0xff]  ;;  %v602_v21 = vadd.f32 %v598_v31, %v594_v33 }
 0x152   :  { %1094 = vmatprep.subr.mxu1 %v1764_v49  ;;  %v350_v61 = vadd.f32 %v346_v4, %v342_v45 }
 0x153   :  { %1110 = vmatpush3.msra.mxu1 %v1764_v49  ;;  %v476_v52 = vadd.f32 %v472_v46, %v468_v50 }
 0x154   :  { %1095 = vmatprep.subr.mxu1 %v1765_v44 }
 0x155   :  { %1111 = vmatpush3.msra.mxu1 %v1765_v44  ;;  %v480_v54 = vadd.f32 %v476_v52, %v350_v61 }
 0x156   :  { %1096 = vmatprep.subr.mxu1 %v1766_v51 }
 0x157   :  { %1112 = vmatpush3.msra.mxu1 %v1766_v51  ;;  %v606_v7 = vadd.f32 %v602_v21, %v480_v54 }
 0x158   :  { %1097 = vmatprep.subr.mxu1 %v1768_v29 }
 0x159   :  { %1113 = vmatpush3.msra.mxu1 %v1768_v29  ;;  %v732_v13 = vadd.f32 %v728_v63, %v606_v7 }
 0x15a   :  { %1098 = vmatprep.subr.mxu1 %v1770_v5 }
 0x15b   :  { %1114 = vmatpush3.msra.mxu1 %v1770_v5 }
 0x15c   :  { %1099 = vmatprep.subr.mxu1 %v1771_v47 }
 0x15d   :  { %1115 = vmatpush3.msra.mxu1 %v1771_v47 }
 0x15e   :  { %1100 = vmatprep.subr.mxu1 %v1772_v38 }
 0x15f   :  { %1116 = vmatpush3.msra.mxu1 %v1772_v38 }
 0x160   :  { %1101 = vmatprep.subr.mxu1 %v1773_v9 }
 0x161   :  { %1117 = vmatpush3.msra.mxu1 %v1773_v9 }
 0x162   :  { %1102 = vmatprep.subr.mxu1 %v1774_v10 }
 0x163   :  { %1118 = vmatpush3.msra.mxu1 %v1774_v10 }
 0x164   :  { %1085 = vmatmul.mubr.f32.vlgmr.msra.gmra.mxu1 %v732_v13 }
 0x203   :  { %v1045_v11 = vpop.f32.mrf.mxu1  ;;  %v1083_v35 = vpop.f32.mrf.mxu0 }
 0x204   :  { %v936_v60 = vsub.f32 %v1045_v11, %v1083_v35 }
 0x205   :  { %v815_v37 = vpop.f32.mrf.mxu1  ;;  %v916_v55 = vpop.f32.mrf.mxu0 }
 0x206   :  { %940 = vst [vmem:[#allocation13 + $0x8] sm:$0xff] %v936_v60  ;;  %v935_v1 = vsub.f32 %v815_v37, %v916_v55 }
 0x208   :  { %939 = vst [vmem:[#allocation13] sm:$0xff] %v935_v1 }
 0x20c   :  { %v1048_v12 = vpop.f32.mrf.mxu1 }
 0x20e   :  { %v825_v25 = vpop.f32.mrf.mxu1 }
 0x224   :  { %v1086_v6 = vpop.f32.mrf.mxu1 }
 0x225   :  { %v938_v16 = vsub.f32 %v1048_v12, %v1086_v6 }
 0x226   :  { %v926_v58 = vpop.f32.mrf.mxu1 }
 0x227   :  { %942 = vst [vmem:[#allocation13 + $0x18] sm:$0xff] %v938_v16  ;;  %v937_v18 = vsub.f32 %v825_v25, %v926_v58 }
 0x229   :  { %941 = vst [vmem:[#allocation13 + $0x10] sm:$0xff] %v937_v18 }
 0x22a   :  { %1265 = shalt.err (!%p1262_p6)
}
 0x22b   :  { %954 = dma.vmem_to_hbm [thread:$0]  %s949_s5, 512, %s1731_s6, [#allocation4], %s1291_s13, %s1291_s13, %s1292_s14  }
 0x22c   :  { %1282 = dma.done.wait [#allocation4], 512  }
 0x22d   :  { %1283 = vsyncadd [#allocation4], 4294966784 }
 0x22e   :  { %958 = vsyncpa [#allocation3], 1 }
 0x22f   :  { %959 = vsyncpa [#allocation6], 1 }
 0x230   :  { %960 = vsyncpa [#allocation9], 1 }
 0x231   :  { %961 = vsyncpa [#allocation12], 1 }
 0x232   :  { %962 = vsyncpa [#allocation4], 1 }

</bundles_post_ra>
